<compile_context>
chip_gen: v7x
topology: tpu7x:2x2x1
jax: 0.10.0
libtpu: 0.0.40
codegen_flags: <defaults>
</compile_context>

<pallas_src>
import functools

import numpy as np
import jax
import jax.numpy as jnp
from jax import lax
from jax.experimental import pallas as pl
from jax.experimental.pallas import tpu as pltpu

H = W = 14            # fixed by the module's 14x14 low-pass mask
HW = H * W            # 196 tokens
HWP = 256             # token axis padded to a full lane-tile multiple
SQRT2_INV = 0.7071067811865476
MAX_BBLK = 8          # cap on images per grid step (keeps unroll small)


def _gelu_exact(x):
    # exact (erf-based) GELU, matching torch.nn.GELU(approximate='none')
    return 0.5 * x * (1.0 + lax.erf(x * SQRT2_INV))


# ----------------------------- Pallas kernel --------------------------------

def qkv_adapter_kernel(x_ref, w1_ref, w2_ref, mdw_ref, kri_ref, wqkv_ref,
                       out_ref):
    bblk = x_ref.shape[0]

    # constant operands: loaded once per grid step, reused for all Bblk images
    w1 = w1_ref[...]                          # (C2, C)        bf16
    w2_taps = [w2_ref[d] for d in range(9)]   # 9 x (C, C2)    bf16
    kri = kri_ref[...]                        # (HWP, 2*HWP)   bf16
    wqkv = wqkv_ref[...]                      # (3C, C)        bf16
    m_l = mdw_ref[0:1, :]                     # keep-mask for dw=-1 taps (f32)
    m_r = mdw_ref[1:2, :]                     # keep-mask for dw=+1 taps (f32)

    # fully unrolled batch loop (bblk <= MAX_BBLK, tiny per-image state)
    for b in range(bblk):
        xT = x_ref[b]                         # (C, HWP) bf16, channel-major

        # conv[0]: 1x1 conv C -> C2, exact GELU (f32 elementwise)
        y1 = _gelu_exact(jnp.dot(w1, xT, preferred_element_type=jnp.float32))
        # pre-mask the horizontal taps in *source* coordinates:
        #   dw=-1 taps must not read source pixels with w == W-1 (row wrap)
        #   dw=+1 taps must not read source pixels with w == 0
        y1l = y1 * m_l
        y1r = y1 * m_r

        # conv[2]: 3x3 conv (padding=1) as 9 lane-rolled copies of y1, each
        # feeding one accumulating (C, C2) @ (C2, HWP) MXU dot.  Zero padding
        # of columns >= HW makes the vertical (dh) wrap read zeros.
        acc = None
        for dh in (-1, 0, 1):
            for dw in (-1, 0, 1):
                src = y1l if dw == -1 else (y1r if dw == 1 else y1)
                shift = (-(dh * W + dw)) % HWP        # s[:, n] = src[:, n+off]
                s = pltpu.roll(src, shift=shift, axis=1) if shift else src
                tap = w2_taps[(dh + 1) * 3 + (dw + 1)]
                t = jnp.dot(tap, s.astype(jnp.bfloat16),
                            preferred_element_type=jnp.float32)
                acc = t if acc is None else acc + t
        y2 = _gelu_exact(acc)                 # (C, HWP) f32

        # spectral filter: fftn -> roll -> low-pass mask -> ifftn -> abs,
        # folded into one real operator [Kr^T | 0 | Ki^T | 0] (N = 512 lanes).
        fri = jnp.dot(y2.astype(jnp.bfloat16), kri,
                      preferred_element_type=jnp.float32)      # (C, 2*HWP)
        fr = fri[:, :HWP]
        fi = fri[:, HWP:]
        filt = jnp.sqrt(fr * fr + fi * fi)                     # (C, HWP) f32

        # fused q/k/v 1x1 convs, channel-major -> lane-dense (256-wide) store
        out_ref[b] = jnp.dot(wqkv, filt.astype(jnp.bfloat16),
                             preferred_element_type=jnp.float32)


# ------------------- host-side constant operator builders -------------------

@functools.lru_cache(maxsize=None)
def _lpf_mask_np():
    mask = np.zeros((H, W), np.float64)
    for xx in range(W):
        for yy in range(H):
            if (xx - (W - 1) / 2) ** 2 + (yy - (H - 1) / 2) ** 2 < 3:
                mask[yy, xx] = 1.0
    return mask


@functools.lru_cache(maxsize=None)
def _kri_np():
    """Transposed spectral operator, (HWP, 2*HWP):
    columns [0:HW]   = Kr^T, columns [HWP:HWP+HW] = Ki^T, rest zero, where
    ifftn(roll(fftn(img)) * mask) == unflatten((Kr + i*Ki) @ flatten(img))."""
    mask = _lpf_mask_np()
    u = np.arange(H)
    FH = np.exp(-2j * np.pi * np.outer(u, u) / H)      # forward DFT (H)
    v = np.arange(W)
    FW = np.exp(-2j * np.pi * np.outer(v, v) / W)
    IFH = np.conj(FH) / H                              # inverse DFT
    IFW = np.conj(FW) / W
    FrH = np.roll(FH, H // 2, axis=0)                  # roll folded into DFT
    FrW = np.roll(FW, W // 2, axis=0)
    A = np.kron(FrH, FrW)                              # (HW, HW)
    Binv = np.kron(IFH, IFW)                           # (HW, HW)
    K = Binv @ (mask.reshape(-1)[:, None] * A)         # complex (HW, HW)
    kri = np.zeros((HWP, 2 * HWP), np.float32)
    kri[:HW, :HW] = K.real.T
    kri[:HW, HWP:HWP + HW] = K.imag.T
    return kri


@functools.lru_cache(maxsize=None)
def _dw_masks_np():
    """(2, HWP) keep-masks in source token coords:
    row 0 (dw=-1 taps): drop columns with w == W-1;
    row 1 (dw=+1 taps): drop columns with w == 0.  Pad columns are zero."""
    m = np.zeros((2, HWP), np.float32)
    for t in range(HW):
        w = t % W
        m[0, t] = 0.0 if w == W - 1 else 1.0
        m[1, t] = 0.0 if w == 0 else 1.0
    return m


def _choose_bblk(batch):
    if batch <= 2:
        return 1
    # >= 2 grid steps (both v7x TensorCores busy), <= MAX_BBLK images per step
    return min(MAX_BBLK, (batch + 1) // 2)


# ------------------------------- wrapper -------------------------------------

@functools.partial(jax.jit, static_argnames=("nums_head",))
def qkv_adapter_vit_spatio_filter(x, w1, w2, wq, wk, wv, nums_head):
    """x: (B, n, dims) with n = 1 + 14*14.  Returns [q, k, v], each
    (B, nums_head, n-1, dims // nums_head), matching the PyTorch module."""
    B, n, C = x.shape
    C2 = w1.shape[0]
    assert n - 1 == HW and C % nums_head == 0

    # constant operators (lru_cached numpy -> baked as jit constants)
    kri = jnp.asarray(_kri_np(), dtype=jnp.bfloat16)          # (HWP, 2*HWP)
    mdw = jnp.asarray(_dw_masks_np(), dtype=jnp.float32)      # (2, HWP)

    # weight repack (bf16 matmul operands)
    w1b = jnp.asarray(w1).astype(jnp.bfloat16)                          # (C2, C)
    w2b = jnp.stack([jnp.asarray(w2)[:, :, kh, kw]
                     for kh in range(3) for kw in range(3)],
                    axis=0).astype(jnp.bfloat16)                        # (9, C, C2)
    wqkvb = jnp.concatenate([jnp.asarray(wq), jnp.asarray(wk),
                             jnp.asarray(wv)], axis=0).astype(jnp.bfloat16)  # (3C, C)

    # channel-major input, class token dropped, token axis padded to HWP lanes
    xT = jnp.transpose(x[:, 1:, :], (0, 2, 1))                          # (B, C, HW)
    xT = jnp.pad(xT, ((0, 0), (0, 0), (0, HWP - HW))).astype(jnp.bfloat16)

    bblk = _choose_bblk(B)
    steps = -(-B // bblk)
    bpad = steps * bblk
    if bpad != B:
        xT = jnp.pad(xT, ((0, bpad - B), (0, 0), (0, 0)))

    qkv = pl.pallas_call(
        qkv_adapter_kernel,
        out_shape=jax.ShapeDtypeStruct((bpad, 3 * C, HWP), jnp.float32),
        grid_spec=pltpu.PrefetchScalarGridSpec(
            num_scalar_prefetch=0,
            grid=(steps,),
            in_specs=[
                pl.BlockSpec((bblk, C, HWP), lambda g: (g, 0, 0)),      # images
                pl.BlockSpec((C2, C), lambda g: (0, 0)),                # w1
                pl.BlockSpec((9, C, C2), lambda g: (0, 0, 0)),          # 3x3 taps
                pl.BlockSpec((2, HWP), lambda g: (0, 0)),               # dw masks
                pl.BlockSpec((HWP, 2 * HWP), lambda g: (0, 0)),         # [Kr^T|Ki^T]
                pl.BlockSpec((3 * C, C), lambda g: (0, 0)),             # [wq;wk;wv]
            ],
            out_specs=pl.BlockSpec((bblk, 3 * C, HWP), lambda g: (g, 0, 0)),
        ),
        compiler_params=pltpu.CompilerParams(
            dimension_semantics=("parallel",)),
    )(xT, w1b, w2b, mdw, kri, wqkvb)

    qkv = qkv[:B, :, :HW]                                               # (B, 3C, HW)
    hd = C // nums_head

    def to_heads(t):                               # t: (B, C, HW) channel-major
        t = jnp.transpose(t, (0, 2, 1))            # (B, HW, C)
        return t.reshape(B, HW, nums_head, hd).transpose(0, 2, 1, 3)

    return [to_heads(qkv[:, :C]), to_heads(qkv[:, C:2 * C]),
            to_heads(qkv[:, 2 * C:])]


# --------------------------- pure-JAX reference ------------------------------

def reference(x, w1, w2, wq, wk, wv, nums_head):
    prec = jax.lax.Precision.HIGHEST
    B, n, C = x.shape
    mask = jnp.asarray(_lpf_mask_np().astype(np.float32))
    img = x[:, 1:, :].reshape(B, H, W, C).transpose(0, 3, 1, 2)         # NCHW
    y1 = _gelu_exact(jnp.einsum('bchw,oc->bohw', img, w1, precision=prec))
    y2 = lax.conv_general_dilated(
        y1, w2, (1, 1), 'SAME',
        dimension_numbers=('NCHW', 'OIHW', 'NCHW'), precision=prec)
    y2 = _gelu_exact(y2)
    f = jnp.fft.fftn(y2.astype(jnp.complex64), axes=(2, 3))
    f = jnp.roll(f, (H // 2, W // 2), axis=(2, 3))
    f = f * mask
    filt = jnp.abs(jnp.fft.ifftn(f, axes=(2, 3)))

    def proj(wc):
        p = jnp.einsum('bchw,oc->bohw', filt, wc, precision=prec)
        p = p.reshape(B, C, HW).transpose(0, 2, 1)
        return p.reshape(B, HW, nums_head, C // nums_head).transpose(0, 2, 1, 3)

    return [proj(wq), proj(wk), proj(wv)]


# ---------------------------------- main -------------------------------------

if __name__ == "__main__":
    B = 3                  # odd batch: exercises batch blocking + pad path
    C = 24                 # input_dims == dims
    nums_head = 12         # head_dim = 2
    reduction = 2
    C2 = C // reduction
    n = 1 + HW             # 197 (14x14 spatial + class token)

    key = jax.random.PRNGKey(0)
    k1, k2, k3, k4, k5, kx = jax.random.split(key, 6)
    w1 = 0.1 * jax.random.normal(k1, (C2, C), jnp.float32)        # Conv2d(C,C2,1)
    w2 = 0.1 * jax.random.normal(k2, (C, C2, 3, 3), jnp.float32)  # Conv2d(C2,C,3,p=1)
    wq = 0.1 * jax.random.normal(k3, (C, C), jnp.float32)         # Conv2d(C,C,1)
    wk = 0.1 * jax.random.normal(k4, (C, C), jnp.float32)
    wv = 0.1 * jax.random.normal(k5, (C, C), jnp.float32)
    x = jax.random.normal(kx, (B, n, C), jnp.float32)

    outs = qkv_adapter_vit_spatio_filter(x, w1, w2, wq, wk, wv,
                                         nums_head=nums_head)
    outs = jax.block_until_ready(outs)

    refs = reference(x, w1, w2, wq, wk, wv, nums_head)
    for got, want in zip(outs, refs):
        assert got.shape == (B, nums_head, n - 1, C // nums_head)
        np.testing.assert_allclose(np.asarray(got), np.asarray(want),
                                   rtol=3e-2, atol=5e-3)

    print("KERNEL_OK")
</pallas_src>

<mosaic_0001>
module attributes {stable_mosaic.version = 11 : i64} {
  func.func @qkv_adapter_kernel(%arg0: i32, %arg1: memref<2x24x256xbf16, #tpu.memory_space<vmem>>, %arg2: memref<12x24xbf16, #tpu.memory_space<vmem>>, %arg3: memref<9x24x12xbf16, #tpu.memory_space<vmem>>, %arg4: memref<2x256xf32, #tpu.memory_space<vmem>>, %arg5: memref<256x512xbf16, #tpu.memory_space<vmem>>, %arg6: memref<72x24xbf16, #tpu.memory_space<vmem>>, %arg7: memref<2x72x256xf32, #tpu.memory_space<vmem>>) attributes {dimension_semantics = [#tpu.dimension_semantics<parallel>], iteration_bounds = array<i64: 2>, scalar_prefetch = 0 : i64, scratch_operands = 0 : i64, tpu.core_type = #tpu.core_type<tc>, window_params = [{transform_indices = @transform_0, window_bounds = array<i64: 2, 24, 256>}, {pipeline_mode = #tpu.pipeline_mode<synchronous>, transform_indices = @transform_1, window_bounds = array<i64: 12, 24>}, {pipeline_mode = #tpu.pipeline_mode<synchronous>, transform_indices = @transform_2, window_bounds = array<i64: 9, 24, 12>}, {pipeline_mode = #tpu.pipeline_mode<synchronous>, transform_indices = @transform_3, window_bounds = array<i64: 2, 256>}, {pipeline_mode = #tpu.pipeline_mode<synchronous>, transform_indices = @transform_4, window_bounds = array<i64: 256, 512>}, {pipeline_mode = #tpu.pipeline_mode<synchronous>, transform_indices = @transform_5, window_bounds = array<i64: 72, 24>}, {transform_indices = @transform_6, window_bounds = array<i64: 2, 72, 256>}]} {
    %c0 = arith.constant 0 : index
    %c0_0 = arith.constant 0 : index
    %0 = vector.load %arg2[%c0, %c0_0] : memref<12x24xbf16, #tpu.memory_space<vmem>>, vector<12x24xbf16>
    %c0_1 = arith.constant 0 : index
    %c0_2 = arith.constant 0 : index
    %c0_3 = arith.constant 0 : index
    %1 = vector.load %arg3[%c0_1, %c0_2, %c0_3] : memref<9x24x12xbf16, #tpu.memory_space<vmem>>, vector<1x24x12xbf16>
    %2 = vector.shape_cast %1 : vector<1x24x12xbf16> to vector<24x12xbf16>
    %c1 = arith.constant 1 : index
    %c0_4 = arith.constant 0 : index
    %c0_5 = arith.constant 0 : index
    %3 = vector.load %arg3[%c1, %c0_4, %c0_5] : memref<9x24x12xbf16, #tpu.memory_space<vmem>>, vector<1x24x12xbf16>
    %4 = vector.shape_cast %3 : vector<1x24x12xbf16> to vector<24x12xbf16>
    %c2 = arith.constant 2 : index
    %c0_6 = arith.constant 0 : index
    %c0_7 = arith.constant 0 : index
    %5 = vector.load %arg3[%c2, %c0_6, %c0_7] : memref<9x24x12xbf16, #tpu.memory_space<vmem>>, vector<1x24x12xbf16>
    %6 = vector.shape_cast %5 : vector<1x24x12xbf16> to vector<24x12xbf16>
    %c3 = arith.constant 3 : index
    %c0_8 = arith.constant 0 : index
    %c0_9 = arith.constant 0 : index
    %7 = vector.load %arg3[%c3, %c0_8, %c0_9] : memref<9x24x12xbf16, #tpu.memory_space<vmem>>, vector<1x24x12xbf16>
    %8 = vector.shape_cast %7 : vector<1x24x12xbf16> to vector<24x12xbf16>
    %c4 = arith.constant 4 : index
    %c0_10 = arith.constant 0 : index
    %c0_11 = arith.constant 0 : index
    %9 = vector.load %arg3[%c4, %c0_10, %c0_11] : memref<9x24x12xbf16, #tpu.memory_space<vmem>>, vector<1x24x12xbf16>
    %10 = vector.shape_cast %9 : vector<1x24x12xbf16> to vector<24x12xbf16>
    %c5 = arith.constant 5 : index
    %c0_12 = arith.constant 0 : index
    %c0_13 = arith.constant 0 : index
    %11 = vector.load %arg3[%c5, %c0_12, %c0_13] : memref<9x24x12xbf16, #tpu.memory_space<vmem>>, vector<1x24x12xbf16>
    %12 = vector.shape_cast %11 : vector<1x24x12xbf16> to vector<24x12xbf16>
    %c6 = arith.constant 6 : index
    %c0_14 = arith.constant 0 : index
    %c0_15 = arith.constant 0 : index
    %13 = vector.load %arg3[%c6, %c0_14, %c0_15] : memref<9x24x12xbf16, #tpu.memory_space<vmem>>, vector<1x24x12xbf16>
    %14 = vector.shape_cast %13 : vector<1x24x12xbf16> to vector<24x12xbf16>
    %c7 = arith.constant 7 : index
    %c0_16 = arith.constant 0 : index
    %c0_17 = arith.constant 0 : index
    %15 = vector.load %arg3[%c7, %c0_16, %c0_17] : memref<9x24x12xbf16, #tpu.memory_space<vmem>>, vector<1x24x12xbf16>
    %16 = vector.shape_cast %15 : vector<1x24x12xbf16> to vector<24x12xbf16>
    %c8 = arith.constant 8 : index
    %c0_18 = arith.constant 0 : index
    %c0_19 = arith.constant 0 : index
    %17 = vector.load %arg3[%c8, %c0_18, %c0_19] : memref<9x24x12xbf16, #tpu.memory_space<vmem>>, vector<1x24x12xbf16>
    %18 = vector.shape_cast %17 : vector<1x24x12xbf16> to vector<24x12xbf16>
    %c0_20 = arith.constant 0 : index
    %c0_21 = arith.constant 0 : index
    %19 = vector.load %arg5[%c0_20, %c0_21] : memref<256x512xbf16, #tpu.memory_space<vmem>>, vector<256x512xbf16>
    %c0_22 = arith.constant 0 : index
    %c0_23 = arith.constant 0 : index
    %20 = vector.load %arg6[%c0_22, %c0_23] : memref<72x24xbf16, #tpu.memory_space<vmem>>, vector<72x24xbf16>
    %c0_24 = arith.constant 0 : index
    %c0_25 = arith.constant 0 : index
    %21 = vector.load %arg4[%c0_24, %c0_25] : memref<2x256xf32, #tpu.memory_space<vmem>>, vector<1x256xf32>
    %c1_26 = arith.constant 1 : index
    %c0_27 = arith.constant 0 : index
    %22 = vector.load %arg4[%c1_26, %c0_27] : memref<2x256xf32, #tpu.memory_space<vmem>>, vector<1x256xf32>
    %c0_28 = arith.constant 0 : index
    %c0_29 = arith.constant 0 : index
    %c0_30 = arith.constant 0 : index
    %23 = vector.load %arg1[%c0_28, %c0_29, %c0_30] : memref<2x24x256xbf16, #tpu.memory_space<vmem>>, vector<1x24x256xbf16>
    %24 = vector.shape_cast %23 : vector<1x24x256xbf16> to vector<24x256xbf16>
    %cst = arith.constant dense<0.000000e+00> : vector<12x256xf32>
    %25 = tpu.matmul %0, %24, %cst {dimension_numbers = #tpu.dot_dimension_numbers<[1], [0], [0], [1], [0, 0, 1, 1], [], []>} : vector<12x24xbf16>, vector<24x256xbf16>, vector<12x256xf32> -> vector<12x256xf32>
    %cst_31 = arith.constant 5.000000e-01 : f32
    %26 = vector.broadcast %cst_31 : f32 to vector<12x256xf32>
    %27 = arith.mulf %26, %25 : vector<12x256xf32>
    %cst_32 = arith.constant 0.707106769 : f32
    %28 = vector.broadcast %cst_32 : f32 to vector<12x256xf32>
    %29 = arith.mulf %25, %28 : vector<12x256xf32>
    %30 = math.erf %29 : vector<12x256xf32>
    %cst_33 = arith.constant 1.000000e+00 : f32
    %31 = vector.broadcast %cst_33 : f32 to vector<12x256xf32>
    %32 = arith.addf %31, %30 : vector<12x256xf32>
    %33 = arith.mulf %27, %32 : vector<12x256xf32>
    %34 = vector.broadcast %21 : vector<1x256xf32> to vector<12x256xf32>
    %35 = arith.mulf %33, %34 : vector<12x256xf32>
    %36 = vector.broadcast %22 : vector<1x256xf32> to vector<12x256xf32>
    %37 = arith.mulf %33, %36 : vector<12x256xf32>
    %c15_i32 = arith.constant 15 : i32
    %38 = tpu.dynamic_rotate %35 by %c15_i32 dim 1 : vector<12x256xf32>, i32 -> vector<12x256xf32>
    %39 = arith.truncf %38 : vector<12x256xf32> to vector<12x256xbf16>
    %cst_34 = arith.constant dense<0.000000e+00> : vector<24x256xf32>
    %40 = tpu.matmul %2, %39, %cst_34 {dimension_numbers = #tpu.dot_dimension_numbers<[1], [0], [0], [1], [0, 0, 1, 1], [], []>} : vector<24x12xbf16>, vector<12x256xbf16>, vector<24x256xf32> -> vector<24x256xf32>
    %c14_i32 = arith.constant 14 : i32
    %41 = tpu.dynamic_rotate %33 by %c14_i32 dim 1 : vector<12x256xf32>, i32 -> vector<12x256xf32>
    %42 = arith.truncf %41 : vector<12x256xf32> to vector<12x256xbf16>
    %cst_35 = arith.constant dense<0.000000e+00> : vector<24x256xf32>
    %43 = tpu.matmul %4, %42, %cst_35 {dimension_numbers = #tpu.dot_dimension_numbers<[1], [0], [0], [1], [0, 0, 1, 1], [], []>} : vector<24x12xbf16>, vector<12x256xbf16>, vector<24x256xf32> -> vector<24x256xf32>
    %44 = arith.addf %40, %43 : vector<24x256xf32>
    %c13_i32 = arith.constant 13 : i32
    %45 = tpu.dynamic_rotate %37 by %c13_i32 dim 1 : vector<12x256xf32>, i32 -> vector<12x256xf32>
    %46 = arith.truncf %45 : vector<12x256xf32> to vector<12x256xbf16>
    %cst_36 = arith.constant dense<0.000000e+00> : vector<24x256xf32>
    %47 = tpu.matmul %6, %46, %cst_36 {dimension_numbers = #tpu.dot_dimension_numbers<[1], [0], [0], [1], [0, 0, 1, 1], [], []>} : vector<24x12xbf16>, vector<12x256xbf16>, vector<24x256xf32> -> vector<24x256xf32>
    %48 = arith.addf %44, %47 : vector<24x256xf32>
    %c1_i32 = arith.constant 1 : i32
    %49 = tpu.dynamic_rotate %35 by %c1_i32 dim 1 : vector<12x256xf32>, i32 -> vector<12x256xf32>
    %50 = arith.truncf %49 : vector<12x256xf32> to vector<12x256xbf16>
    %cst_37 = arith.constant dense<0.000000e+00> : vector<24x256xf32>
    %51 = tpu.matmul %8, %50, %cst_37 {dimension_numbers = #tpu.dot_dimension_numbers<[1], [0], [0], [1], [0, 0, 1, 1], [], []>} : vector<24x12xbf16>, vector<12x256xbf16>, vector<24x256xf32> -> vector<24x256xf32>
    %52 = arith.addf %48, %51 : vector<24x256xf32>
    %53 = arith.truncf %33 : vector<12x256xf32> to vector<12x256xbf16>
    %cst_38 = arith.constant dense<0.000000e+00> : vector<24x256xf32>
    %54 = tpu.matmul %10, %53, %cst_38 {dimension_numbers = #tpu.dot_dimension_numbers<[1], [0], [0], [1], [0, 0, 1, 1], [], []>} : vector<24x12xbf16>, vector<12x256xbf16>, vector<24x256xf32> -> vector<24x256xf32>
    %55 = arith.addf %52, %54 : vector<24x256xf32>
    %c255_i32 = arith.constant 255 : i32
    %56 = tpu.dynamic_rotate %37 by %c255_i32 dim 1 : vector<12x256xf32>, i32 -> vector<12x256xf32>
    %57 = arith.truncf %56 : vector<12x256xf32> to vector<12x256xbf16>
    %cst_39 = arith.constant dense<0.000000e+00> : vector<24x256xf32>
    %58 = tpu.matmul %12, %57, %cst_39 {dimension_numbers = #tpu.dot_dimension_numbers<[1], [0], [0], [1], [0, 0, 1, 1], [], []>} : vector<24x12xbf16>, vector<12x256xbf16>, vector<24x256xf32> -> vector<24x256xf32>
    %59 = arith.addf %55, %58 : vector<24x256xf32>
    %c243_i32 = arith.constant 243 : i32
    %60 = tpu.dynamic_rotate %35 by %c243_i32 dim 1 : vector<12x256xf32>, i32 -> vector<12x256xf32>
    %61 = arith.truncf %60 : vector<12x256xf32> to vector<12x256xbf16>
    %cst_40 = arith.constant dense<0.000000e+00> : vector<24x256xf32>
    %62 = tpu.matmul %14, %61, %cst_40 {dimension_numbers = #tpu.dot_dimension_numbers<[1], [0], [0], [1], [0, 0, 1, 1], [], []>} : vector<24x12xbf16>, vector<12x256xbf16>, vector<24x256xf32> -> vector<24x256xf32>
    %63 = arith.addf %59, %62 : vector<24x256xf32>
    %c242_i32 = arith.constant 242 : i32
    %64 = tpu.dynamic_rotate %33 by %c242_i32 dim 1 : vector<12x256xf32>, i32 -> vector<12x256xf32>
    %65 = arith.truncf %64 : vector<12x256xf32> to vector<12x256xbf16>
    %cst_41 = arith.constant dense<0.000000e+00> : vector<24x256xf32>
    %66 = tpu.matmul %16, %65, %cst_41 {dimension_numbers = #tpu.dot_dimension_numbers<[1], [0], [0], [1], [0, 0, 1, 1], [], []>} : vector<24x12xbf16>, vector<12x256xbf16>, vector<24x256xf32> -> vector<24x256xf32>
    %67 = arith.addf %63, %66 : vector<24x256xf32>
    %c241_i32 = arith.constant 241 : i32
    %68 = tpu.dynamic_rotate %37 by %c241_i32 dim 1 : vector<12x256xf32>, i32 -> vector<12x256xf32>
    %69 = arith.truncf %68 : vector<12x256xf32> to vector<12x256xbf16>
    %cst_42 = arith.constant dense<0.000000e+00> : vector<24x256xf32>
    %70 = tpu.matmul %18, %69, %cst_42 {dimension_numbers = #tpu.dot_dimension_numbers<[1], [0], [0], [1], [0, 0, 1, 1], [], []>} : vector<24x12xbf16>, vector<12x256xbf16>, vector<24x256xf32> -> vector<24x256xf32>
    %71 = arith.addf %67, %70 : vector<24x256xf32>
    %cst_43 = arith.constant 5.000000e-01 : f32
    %72 = vector.broadcast %cst_43 : f32 to vector<24x256xf32>
    %73 = arith.mulf %72, %71 : vector<24x256xf32>
    %cst_44 = arith.constant 0.707106769 : f32
    %74 = vector.broadcast %cst_44 : f32 to vector<24x256xf32>
    %75 = arith.mulf %71, %74 : vector<24x256xf32>
    %76 = math.erf %75 : vector<24x256xf32>
    %cst_45 = arith.constant 1.000000e+00 : f32
    %77 = vector.broadcast %cst_45 : f32 to vector<24x256xf32>
    %78 = arith.addf %77, %76 : vector<24x256xf32>
    %79 = arith.mulf %73, %78 : vector<24x256xf32>
    %80 = arith.truncf %79 : vector<24x256xf32> to vector<24x256xbf16>
    %cst_46 = arith.constant dense<0.000000e+00> : vector<24x512xf32>
    %81 = tpu.matmul %80, %19, %cst_46 {dimension_numbers = #tpu.dot_dimension_numbers<[1], [0], [0], [1], [0, 0, 1, 1], [], []>} : vector<24x256xbf16>, vector<256x512xbf16>, vector<24x512xf32> -> vector<24x512xf32>
    %82 = vector.extract_strided_slice %81 {offsets = [0, 0], sizes = [24, 256], strides = [1, 1]} : vector<24x512xf32> to vector<24x256xf32>
    %83 = vector.extract_strided_slice %81 {offsets = [0, 256], sizes = [24, 256], strides = [1, 1]} : vector<24x512xf32> to vector<24x256xf32>
    %84 = arith.mulf %82, %82 : vector<24x256xf32>
    %85 = arith.mulf %83, %83 : vector<24x256xf32>
    %86 = arith.addf %84, %85 : vector<24x256xf32>
    %87 = math.sqrt %86 : vector<24x256xf32>
    %88 = arith.truncf %87 : vector<24x256xf32> to vector<24x256xbf16>
    %cst_47 = arith.constant dense<0.000000e+00> : vector<72x256xf32>
    %89 = tpu.matmul %20, %88, %cst_47 {dimension_numbers = #tpu.dot_dimension_numbers<[1], [0], [0], [1], [0, 0, 1, 1], [], []>} : vector<72x24xbf16>, vector<24x256xbf16>, vector<72x256xf32> -> vector<72x256xf32>
    %c0_48 = arith.constant 0 : index
    %c0_49 = arith.constant 0 : index
    %c0_50 = arith.constant 0 : index
    %90 = vector.load %arg7[%c0_48, %c0_49, %c0_50] : memref<2x72x256xf32, #tpu.memory_space<vmem>>, vector<1x72x256xf32>
    %91 = vector.shape_cast %90 : vector<1x72x256xf32> to vector<72x256xf32>
    %92 = vector.shape_cast %89 : vector<72x256xf32> to vector<1x72x256xf32>
    tpu.vector_store %arg7[%c0_48, %c0_49, %c0_50], %92 {strides = array<i32>} : memref<2x72x256xf32, #tpu.memory_space<vmem>>, vector<1x72x256xf32>,
    %c1_51 = arith.constant 1 : index
    %c0_52 = arith.constant 0 : index
    %c0_53 = arith.constant 0 : index
    %93 = vector.load %arg1[%c1_51, %c0_52, %c0_53] : memref<2x24x256xbf16, #tpu.memory_space<vmem>>, vector<1x24x256xbf16>
    %94 = vector.shape_cast %93 : vector<1x24x256xbf16> to vector<24x256xbf16>
    %cst_54 = arith.constant dense<0.000000e+00> : vector<12x256xf32>
    %95 = tpu.matmul %0, %94, %cst_54 {dimension_numbers = #tpu.dot_dimension_numbers<[1], [0], [0], [1], [0, 0, 1, 1], [], []>} : vector<12x24xbf16>, vector<24x256xbf16>, vector<12x256xf32> -> vector<12x256xf32>
    %cst_55 = arith.constant 5.000000e-01 : f32
    %96 = vector.broadcast %cst_55 : f32 to vector<12x256xf32>
    %97 = arith.mulf %96, %95 : vector<12x256xf32>
    %cst_56 = arith.constant 0.707106769 : f32
    %98 = vector.broadcast %cst_56 : f32 to vector<12x256xf32>
    %99 = arith.mulf %95, %98 : vector<12x256xf32>
    %100 = math.erf %99 : vector<12x256xf32>
    %cst_57 = arith.constant 1.000000e+00 : f32
    %101 = vector.broadcast %cst_57 : f32 to vector<12x256xf32>
    %102 = arith.addf %101, %100 : vector<12x256xf32>
    %103 = arith.mulf %97, %102 : vector<12x256xf32>
    %104 = vector.broadcast %21 : vector<1x256xf32> to vector<12x256xf32>
    %105 = arith.mulf %103, %104 : vector<12x256xf32>
    %106 = vector.broadcast %22 : vector<1x256xf32> to vector<12x256xf32>
    %107 = arith.mulf %103, %106 : vector<12x256xf32>
    %c15_i32_58 = arith.constant 15 : i32
    %108 = tpu.dynamic_rotate %105 by %c15_i32_58 dim 1 : vector<12x256xf32>, i32 -> vector<12x256xf32>
    %109 = arith.truncf %108 : vector<12x256xf32> to vector<12x256xbf16>
    %cst_59 = arith.constant dense<0.000000e+00> : vector<24x256xf32>
    %110 = tpu.matmul %2, %109, %cst_59 {dimension_numbers = #tpu.dot_dimension_numbers<[1], [0], [0], [1], [0, 0, 1, 1], [], []>} : vector<24x12xbf16>, vector<12x256xbf16>, vector<24x256xf32> -> vector<24x256xf32>
    %c14_i32_60 = arith.constant 14 : i32
    %111 = tpu.dynamic_rotate %103 by %c14_i32_60 dim 1 : vector<12x256xf32>, i32 -> vector<12x256xf32>
    %112 = arith.truncf %111 : vector<12x256xf32> to vector<12x256xbf16>
    %cst_61 = arith.constant dense<0.000000e+00> : vector<24x256xf32>
    %113 = tpu.matmul %4, %112, %cst_61 {dimension_numbers = #tpu.dot_dimension_numbers<[1], [0], [0], [1], [0, 0, 1, 1], [], []>} : vector<24x12xbf16>, vector<12x256xbf16>, vector<24x256xf32> -> vector<24x256xf32>
    %114 = arith.addf %110, %113 : vector<24x256xf32>
    %c13_i32_62 = arith.constant 13 : i32
    %115 = tpu.dynamic_rotate %107 by %c13_i32_62 dim 1 : vector<12x256xf32>, i32 -> vector<12x256xf32>
    %116 = arith.truncf %115 : vector<12x256xf32> to vector<12x256xbf16>
    %cst_63 = arith.constant dense<0.000000e+00> : vector<24x256xf32>
    %117 = tpu.matmul %6, %116, %cst_63 {dimension_numbers = #tpu.dot_dimension_numbers<[1], [0], [0], [1], [0, 0, 1, 1], [], []>} : vector<24x12xbf16>, vector<12x256xbf16>, vector<24x256xf32> -> vector<24x256xf32>
    %118 = arith.addf %114, %117 : vector<24x256xf32>
    %c1_i32_64 = arith.constant 1 : i32
    %119 = tpu.dynamic_rotate %105 by %c1_i32_64 dim 1 : vector<12x256xf32>, i32 -> vector<12x256xf32>
    %120 = arith.truncf %119 : vector<12x256xf32> to vector<12x256xbf16>
    %cst_65 = arith.constant dense<0.000000e+00> : vector<24x256xf32>
    %121 = tpu.matmul %8, %120, %cst_65 {dimension_numbers = #tpu.dot_dimension_numbers<[1], [0], [0], [1], [0, 0, 1, 1], [], []>} : vector<24x12xbf16>, vector<12x256xbf16>, vector<24x256xf32> -> vector<24x256xf32>
    %122 = arith.addf %118, %121 : vector<24x256xf32>
    %123 = arith.truncf %103 : vector<12x256xf32> to vector<12x256xbf16>
    %cst_66 = arith.constant dense<0.000000e+00> : vector<24x256xf32>
    %124 = tpu.matmul %10, %123, %cst_66 {dimension_numbers = #tpu.dot_dimension_numbers<[1], [0], [0], [1], [0, 0, 1, 1], [], []>} : vector<24x12xbf16>, vector<12x256xbf16>, vector<24x256xf32> -> vector<24x256xf32>
    %125 = arith.addf %122, %124 : vector<24x256xf32>
    %c255_i32_67 = arith.constant 255 : i32
    %126 = tpu.dynamic_rotate %107 by %c255_i32_67 dim 1 : vector<12x256xf32>, i32 -> vector<12x256xf32>
    %127 = arith.truncf %126 : vector<12x256xf32> to vector<12x256xbf16>
    %cst_68 = arith.constant dense<0.000000e+00> : vector<24x256xf32>
    %128 = tpu.matmul %12, %127, %cst_68 {dimension_numbers = #tpu.dot_dimension_numbers<[1], [0], [0], [1], [0, 0, 1, 1], [], []>} : vector<24x12xbf16>, vector<12x256xbf16>, vector<24x256xf32> -> vector<24x256xf32>
    %129 = arith.addf %125, %128 : vector<24x256xf32>
    %c243_i32_69 = arith.constant 243 : i32
    %130 = tpu.dynamic_rotate %105 by %c243_i32_69 dim 1 : vector<12x256xf32>, i32 -> vector<12x256xf32>
    %131 = arith.truncf %130 : vector<12x256xf32> to vector<12x256xbf16>
    %cst_70 = arith.constant dense<0.000000e+00> : vector<24x256xf32>
    %132 = tpu.matmul %14, %131, %cst_70 {dimension_numbers = #tpu.dot_dimension_numbers<[1], [0], [0], [1], [0, 0, 1, 1], [], []>} : vector<24x12xbf16>, vector<12x256xbf16>, vector<24x256xf32> -> vector<24x256xf32>
    %133 = arith.addf %129, %132 : vector<24x256xf32>
    %c242_i32_71 = arith.constant 242 : i32
    %134 = tpu.dynamic_rotate %103 by %c242_i32_71 dim 1 : vector<12x256xf32>, i32 -> vector<12x256xf32>
    %135 = arith.truncf %134 : vector<12x256xf32> to vector<12x256xbf16>
    %cst_72 = arith.constant dense<0.000000e+00> : vector<24x256xf32>
    %136 = tpu.matmul %16, %135, %cst_72 {dimension_numbers = #tpu.dot_dimension_numbers<[1], [0], [0], [1], [0, 0, 1, 1], [], []>} : vector<24x12xbf16>, vector<12x256xbf16>, vector<24x256xf32> -> vector<24x256xf32>
    %137 = arith.addf %133, %136 : vector<24x256xf32>
    %c241_i32_73 = arith.constant 241 : i32
    %138 = tpu.dynamic_rotate %107 by %c241_i32_73 dim 1 : vector<12x256xf32>, i32 -> vector<12x256xf32>
    %139 = arith.truncf %138 : vector<12x256xf32> to vector<12x256xbf16>
    %cst_74 = arith.constant dense<0.000000e+00> : vector<24x256xf32>
    %140 = tpu.matmul %18, %139, %cst_74 {dimension_numbers = #tpu.dot_dimension_numbers<[1], [0], [0], [1], [0, 0, 1, 1], [], []>} : vector<24x12xbf16>, vector<12x256xbf16>, vector<24x256xf32> -> vector<24x256xf32>
    %141 = arith.addf %137, %140 : vector<24x256xf32>
    %cst_75 = arith.constant 5.000000e-01 : f32
    %142 = vector.broadcast %cst_75 : f32 to vector<24x256xf32>
    %143 = arith.mulf %142, %141 : vector<24x256xf32>
    %cst_76 = arith.constant 0.707106769 : f32
    %144 = vector.broadcast %cst_76 : f32 to vector<24x256xf32>
    %145 = arith.mulf %141, %144 : vector<24x256xf32>
    %146 = math.erf %145 : vector<24x256xf32>
    %cst_77 = arith.constant 1.000000e+00 : f32
    %147 = vector.broadcast %cst_77 : f32 to vector<24x256xf32>
    %148 = arith.addf %147, %146 : vector<24x256xf32>
    %149 = arith.mulf %143, %148 : vector<24x256xf32>
    %150 = arith.truncf %149 : vector<24x256xf32> to vector<24x256xbf16>
    %cst_78 = arith.constant dense<0.000000e+00> : vector<24x512xf32>
    %151 = tpu.matmul %150, %19, %cst_78 {dimension_numbers = #tpu.dot_dimension_numbers<[1], [0], [0], [1], [0, 0, 1, 1], [], []>} : vector<24x256xbf16>, vector<256x512xbf16>, vector<24x512xf32> -> vector<24x512xf32>
    %152 = vector.extract_strided_slice %151 {offsets = [0, 0], sizes = [24, 256], strides = [1, 1]} : vector<24x512xf32> to vector<24x256xf32>
    %153 = vector.extract_strided_slice %151 {offsets = [0, 256], sizes = [24, 256], strides = [1, 1]} : vector<24x512xf32> to vector<24x256xf32>
    %154 = arith.mulf %152, %152 : vector<24x256xf32>
    %155 = arith.mulf %153, %153 : vector<24x256xf32>
    %156 = arith.addf %154, %155 : vector<24x256xf32>
    %157 = math.sqrt %156 : vector<24x256xf32>
    %158 = arith.truncf %157 : vector<24x256xf32> to vector<24x256xbf16>
    %cst_79 = arith.constant dense<0.000000e+00> : vector<72x256xf32>
    %159 = tpu.matmul %20, %158, %cst_79 {dimension_numbers = #tpu.dot_dimension_numbers<[1], [0], [0], [1], [0, 0, 1, 1], [], []>} : vector<72x24xbf16>, vector<24x256xbf16>, vector<72x256xf32> -> vector<72x256xf32>
    %c1_80 = arith.constant 1 : index
    %c0_81 = arith.constant 0 : index
    %c0_82 = arith.constant 0 : index
    %160 = vector.load %arg7[%c1_80, %c0_81, %c0_82] : memref<2x72x256xf32, #tpu.memory_space<vmem>>, vector<1x72x256xf32>
    %161 = vector.shape_cast %160 : vector<1x72x256xf32> to vector<72x256xf32>
    %162 = vector.shape_cast %159 : vector<72x256xf32> to vector<1x72x256xf32>
    tpu.vector_store %arg7[%c1_80, %c0_81, %c0_82], %162 {strides = array<i32>} : memref<2x72x256xf32, #tpu.memory_space<vmem>>, vector<1x72x256xf32>,
    return
  }
  func.func @transform_0(%arg0: i32) -> (i32, i32, i32) {
    %c0_i32 = arith.constant 0 : i32
    %c0_i32_0 = arith.constant 0 : i32
    %c0_i32_1 = arith.constant 0 : i32
    return %arg0, %c0_i32, %c0_i32_0 : i32, i32, i32
  }
  func.func @transform_1(%arg0: i32) -> (i32, i32) {
    %c0_i32 = arith.constant 0 : i32
    %c0_i32_0 = arith.constant 0 : i32
    %c0_i32_1 = arith.constant 0 : i32
    return %c0_i32, %c0_i32_0 : i32, i32
  }
  func.func @transform_2(%arg0: i32) -> (i32, i32, i32) {
    %c0_i32 = arith.constant 0 : i32
    %c0_i32_0 = arith.constant 0 : i32
    %c0_i32_1 = arith.constant 0 : i32
    %c0_i32_2 = arith.constant 0 : i32
    return %c0_i32, %c0_i32_0, %c0_i32_1 : i32, i32, i32
  }
  func.func @transform_3(%arg0: i32) -> (i32, i32) {
    %c0_i32 = arith.constant 0 : i32
    %c0_i32_0 = arith.constant 0 : i32
    %c0_i32_1 = arith.constant 0 : i32
    return %c0_i32, %c0_i32_0 : i32, i32
  }
  func.func @transform_4(%arg0: i32) -> (i32, i32) {
    %c0_i32 = arith.constant 0 : i32
    %c0_i32_0 = arith.constant 0 : i32
    %c0_i32_1 = arith.constant 0 : i32
    return %c0_i32, %c0_i32_0 : i32, i32
  }
  func.func @transform_5(%arg0: i32) -> (i32, i32) {
    %c0_i32 = arith.constant 0 : i32
    %c0_i32_0 = arith.constant 0 : i32
    %c0_i32_1 = arith.constant 0 : i32
    return %c0_i32, %c0_i32_0 : i32, i32
  }
  func.func @transform_6(%arg0: i32) -> (i32, i32, i32) {
    %c0_i32 = arith.constant 0 : i32
    %c0_i32_0 = arith.constant 0 : i32
    %c0_i32_1 = arith.constant 0 : i32
    return %arg0, %c0_i32, %c0_i32_0 : i32, i32, i32
  }
}

</mosaic_0001>

<bundles_post_ra>
// kernel: qkv_adapter_vit_spatio_filter.1
= control target key start
LH: loop header
LB: loop body
LE: loop exit
PB: predicated region body
PF: predicated region fallthrough
CT: control target
= control target key end

     0   :  { %s3922_s21 = smov 0   ;;  %s5010_s0 = inlined_call_operand.vmem [shape: bf16[4,24,256], index: 0, kind: input, shape index: {}]   ;;  %s5011_s1 = inlined_call_operand.vmem [shape: bf16[12,24], index: 1, kind: input, shape index: {}]   ;;  %s5012_s2 = inlined_call_operand.vmem [shape: bf16[9,24,12], index: 2, kind: input, shape index: {}]   ;;  %s5013_s3 = inlined_call_operand.vmem [shape: f32[2,256], index: 3, kind: input, shape index: {}]   ;;  %s5014_s4 = inlined_call_operand.vmem [shape: bf16[256,512], index: 4, kind: input, shape index: {}]   ;;  %s5015_s5 = inlined_call_operand.vmem [shape: bf16[72,24], index: 5, kind: input, shape index: {}]   ;;  %s5016_s6 = inlined_call_operand.vmem [shape: f32[4,72,256], index: 6, kind: output, shape index: {}]  }
   0x1 LB: > { %s3100_s22 = sadd.s32 4294967295, %s3876_s21   ;;  %p3104_p0 = scmp.ge.s32.totalorder %s3876_s21, 1  ;;  %s3876_s21 = sphi %s3922_s21, %s16_s21  }
   0x2   : > { %p214_p1 = scmp.lt.s32.totalorder %s3876_s21, 3 }
   0x4   : > { %p215_p2 = pnand %p3104_p0, %p214_p1 }
   0x6   : > { %218 = sbr.rel (%p215_p2) target bundleno = 2101 (0x835), region = 44 }
   0xd   : > { %s3105_s23 = sshll.u32 %s3100_s22, 1  ;;  %v5019_v0 = vmov 0   ;;  %vm401_vm0 = vcmask 1043456   ;;  %v3633_v7 = vld [vmem:[%s5011_s1] sm:$0x3f]   ;;  %vm397_vm1 = vcmask 195584   ;;  %v472_v13 = vlaneseq }
   0xe   : > { %p247_p3 = scmp.lt.s32.totalorder %s3105_s23, 3  ;;  %440 = vmatprep.mubr.bf16.mxu0 %v5019_v0  ;;  %658 = vmatprep.mubr.bf16.mxu1 %v5019_v0  ;;  %v3133_v20 = vld [vmem:[%s5013_s3 + $0x1] ss:$2 sm:$0x3]  ;;  %s3879_s10 = smov 13   ;;  %vm548_vm4 = vcmask 1045504  }
   0xf   : > { %v473_v17 = vshrl.u32 %v472_v13, 7  ;;  %v371_v21 = vld [vmem:[%s5013_s3] ss:$2 sm:$0x3]  ;;  %s3880_s11 = smov 15   ;;  %s3881_s12 = smov 1  }
  0x10   : > { %s5060_s23 = smov (!%p247_p3, %s3105_s23), 3  ;;  %s3882_s13 = smov 127   ;;  %v4014_v60 = vand.u32 127, %v472_v13  ;;  %vm541_vm6 = vcmask 97280  }
  0x11   : > { %s3449_s24 = smul.u32 24, %s5060_s23  ;;  %v474_v18 = vsub.s32 0, %v473_v17  ;;  %v478_v19 = vsub.s32 1, %v473_v17  ;;  %s3883_s14 = smov 115  }
  0x12   : > { %s3884_s15 = smov 114   ;;  %s3885_s16 = smov 14   ;;  %vm511_vm2 = vcmp.lt.s32.totalorder %v4014_v60, 15  ;;  %vm685_vm3 = vcmp.lt.s32.totalorder %v4014_v60, 13  ;;  %vm777_vm5 = vcmp.lt.s32.totalorder %v4014_v60, 1  ;;  %vm526_vm7 = vcmp.lt.s32.totalorder %v4014_v60, 14 }
  0x13   : > { %s3938_s27 = scalar_lea.vmem %s5010_s0, %s3449_s24  ;;  %v3957_v26 = vrot.slane %v3133_v20, %v474_v18  ;;  %v3959_v27 = vrot.slane %v3133_v20, %v478_v19  ;;  %v3961_v31 = vrot.slane %v371_v21, %v474_v18  ;;  %v3963_v32 = vrot.slane %v371_v21, %v478_v19  ;;  %s3886_s17 = smov 113  }
  0x14   : > { %v3628_v1 = vld [vmem:[%s3938_s27 + $0x4] ss:$8 sps:$4 sm:$0xff]   ;;  %v3630_v2 = vld [vmem:[%s3938_s27] ss:$8 sps:$4 sm:$0xff]   ;;  %v376_v3 = vld [vmem:[%s3938_s27 + $0x10] sm:$0xff]  ;;  %vm948_vm8 = vcmp.lt.s32.totalorder %v4014_v60, 127 }
  0x15   : > { %408 = vmatprep.subr.bf16.mxu0 %v3628_v1  ;;  %v3138_v4 = vcombine.high %v376_v3, %v376_v3  ;;  %v3137_v5 = vcombine.low %v376_v3, %v376_v3  ;;  %vm5025_vm9 = vcmp.lt.s32.totalorder %v4014_v60, 115  ;;  %vm5018_vm10 = vcmp.lt.s32.totalorder %v4014_v60, 114  ;;  %s3450_s18 = smul.u32 144, %s5060_s23 }
  0x16   : > { %409 = vmatpush1.bf16.msra.mxu0 %v3630_v2  ;;  %vm5017_vm11 = vcmp.lt.s32.totalorder %v4014_v60, 113 }
  0x17   : > { %3139 = vmatprep.subr.msk.bf16.mxu0 %vm401_vm0, %v3138_v4  ;;  %v403_v6 = vsel %vm401_vm0, %v3137_v5, 0  ;;  %s4893_s22 = scalar_lea.vmem %s5016_s6, %s3450_s18 }
  0x1a   : > { %411 = vmatpush1.bf16.msra.mxu0 %v403_v6 }
  0x1d   : > { %3140 = vmatmul.mubr.msk.bf16.vlgmr.msra.gmra.mrb[0].mxu0 %vm397_vm1, %v3633_v7 }
  0x1e   : > { %587 = vmatprep.mubr.bf16.mxu0 %v5019_v0 }
  0xf0   : > { %v442_v8 = vpop.f32.mrb[0].mxu0 }
  0xf1   : > { %v455_v9 = vmul.f32 0.70710677, %v442_v8  ;;  %v444_v10 = vpop.f32.mrb[1].mxu0  ;;  %v451_v24 = vmul.f32 0.5, %v442_v8 }
  0xf2   : > { %v456_v11 = vmul.f32 0.70710677, %v444_v10  ;;  %v446_v12 = vpop.f32.mrb[2].mxu0  ;;  %v452_v29 = vmul.f32 0.5, %v444_v10 }
  0xf3   : > { %3758 = verf.f32 %v455_v9  ;;  %v457_v14 = vmul.f32 0.70710677, %v446_v12  ;;  %v448_v15 = vpop.f32.mrb[3].mxu0  ;;  %v453_v35 = vmul.f32 0.5, %v446_v12 }
  0xf4   : > { %3760 = verf.f32 %v456_v11  ;;  %v458_v16 = vmul.f32 0.70710677, %v448_v15  ;;  %v454_v38 = vmul.f32 0.5, %v448_v15 }
  0xf5   : > { %3762 = verf.f32 %v457_v14 }
  0xf6   : > { %3764 = verf.f32 %v458_v16 }
  0xfd   : > { %v3759_v22 = vpop.eup %3758 }
  0xfe   : > { %v3761_v23 = vpop.eup %3760  ;;  %v463_v25 = vadd.f32 1.0, %v3759_v22 }
  0xff   : > { %v3763_v28 = vpop.eup %3762  ;;  %v464_v30 = vadd.f32 1.0, %v3761_v23 }
 0x100   : > { %v3765_v33 = vpop.eup %3764  ;;  %v3965_v34 = vmul.f32 %v463_v25, %v451_v24  ;;  %v465_v36 = vadd.f32 1.0, %v3763_v28 }
 0x101   : > { %v3967_v37 = vmul.f32 %v464_v30, %v452_v29  ;;  %v466_v39 = vadd.f32 1.0, %v3765_v33  ;;  %v3634_v30 = vld [vmem:[%s5012_s2] sm:$0xff]  }
 0x102   : > { %v3969_v40 = vmul.f32 %v465_v36, %v453_v35  ;;  %v497_v41 = vmul.f32 %v3957_v26, %v3965_v34  ;;  %v482_v43 = vmul.f32 %v3961_v31, %v3965_v34 }
 0x103   : > { %v3973_v42 = vmul.f32 %v466_v39, %v454_v38  ;;  %v498_v44 = vmul.f32 %v3959_v27, %v3967_v37  ;;  %v483_v45 = vmul.f32 %v3963_v32, %v3967_v37 }
 0x104   : > { %v499_v46 = vmul.f32 %v3957_v26, %v3969_v40  ;;  %v484_v47 = vmul.f32 %v3961_v31, %v3969_v40  ;;  %v3518_v48 = vpack.i.bf16 %v3969_v40, %v3965_v34  ;;  %v861_v57 = vpack.c.bf16 %v3969_v40, %v3965_v34  ;;  %v3639_v34 = vld [vmem:[%s5012_s2 + $0x2c] ss:$0 sps:$4 sm:$0xff]   ;;  %v3672_v40 = vld [vmem:[%s5014_s4 + $0xc4] ss:$16 sps:$4 sm:$0xff]  }
 0x105   : > { %v500_v49 = vmul.f32 %v3959_v27, %v3973_v42  ;;  %v485_v50 = vmul.f32 %v3963_v32, %v3973_v42  ;;  %v3523_v51 = vpack.i.bf16 %v3973_v42, %v3967_v37  ;;  %v862_v56 = vpack.c.bf16 %v3973_v42, %v3967_v37  ;;  %v3660_v37 = vld [vmem:[%s5014_s4 + $0x44] ss:$16 sps:$4 sm:$0xff]   ;;  %v3658_v42 = vld [vmem:[%s5014_s4 + $0x40] ss:$16 sps:$4 sm:$0xff]  }
 0x106   : > { %v3478_v52 = vpack.i.bf16 %v499_v46, %v497_v41  ;;  %v3468_v53 = vpack.i.bf16 %v484_v47, %v482_v43  ;;  %v3635_v46 = vld [vmem:[%s5012_s2 + $0x8] ss:$0 sps:$4 sm:$0xff]  }
 0x107   : > { %v3483_v54 = vpack.i.bf16 %v500_v49, %v498_v44  ;;  %v3473_v55 = vpack.i.bf16 %v485_v50, %v483_v45 }
 0x108   : > { %3479 = vrot.lane.b32.xlu1 %v3478_v52, %s3879_s10  ;;  %3469 = vrot.lane.b32.xlu0 %v3468_v53, %s3880_s11 }
 0x10c   : > { %3484 = vrot.lane.b32.xlu1 %v3483_v54, %s3879_s10  ;;  %3474 = vrot.lane.b32.xlu0 %v3473_v55, %s3880_s11 }
 0x110   : > { %3494 = vrot.lane.b32.xlu1 %v3473_v55, %s3881_s12  ;;  %3489 = vrot.lane.b32.xlu0 %v3468_v53, %s3881_s12 }
 0x114   : > { %3504 = vrot.lane.b32.xlu1 %v3483_v54, %s3882_s13  ;;  %3499 = vrot.lane.b32.xlu0 %v3478_v52, %s3882_s13 }
 0x118   : > { %3514 = vrot.lane.b32.xlu1 %v3473_v55, %s3883_s14  ;;  %3509 = vrot.lane.b32.xlu0 %v3468_v53, %s3883_s14 }
 0x11c   : > { %3524 = vrot.lane.b32.xlu1 %v3523_v51, %s3884_s15  ;;  %3519 = vrot.lane.b32.xlu0 %v3518_v48, %s3884_s15 }
 0x120   : > { %3534 = vrot.lane.b32.xlu1 %v3523_v51, %s3885_s16  ;;  %3529 = vrot.lane.b32.xlu0 %v3518_v48, %s3885_s16 }
 0x124   : > { %3544 = vrot.lane.b32.xlu1 %v3483_v54, %s3886_s17  ;;  %3539 = vrot.lane.b32.xlu0 %v3478_v52, %s3886_s17 }
 0x17a   : > { %v3480_v58 = vpop.permute.xlu1 %3479  ;;  %v3470_v59 = vpop.permute.xlu0 %3469 }
 0x17b   : > { %v3472_v3 = vunpack.i.h.bf16 %v3470_v59  ;;  %v3471_v4 = vunpack.i.l.bf16 %v3470_v59  ;;  %v3482_v6 = vunpack.i.h.bf16 %v3480_v58  ;;  %v3481_v7 = vunpack.i.l.bf16 %v3480_v58 }
 0x17e   : > { %v3485_v61 = vpop.permute.xlu1 %3484  ;;  %v3475_v62 = vpop.permute.xlu0 %3474 }
 0x17f   : > { %v3487_v63 = vunpack.i.h.bf16 %v3485_v61  ;;  %v3477_v1 = vunpack.i.h.bf16 %v3475_v62  ;;  %v3476_v2 = vunpack.i.l.bf16 %v3475_v62  ;;  %v3486_v5 = vunpack.i.l.bf16 %v3485_v61 }
 0x181   : > { %v512_v10 = vsel %vm511_vm2, %v3471_v4, %v3476_v2  ;;  %v513_v11 = vsel %vm511_vm2, %v3472_v3, %v3477_v1  ;;  %v687_v12 = vsel %vm685_vm3, %v3482_v6, %v3487_v63  ;;  %v689_v13 = vsel %vm685_vm3, %v3487_v63, %v3482_v6  ;;  %v3652_v6 = vld [vmem:[%s5014_s4] ss:$16 sps:$4 sm:$0xff]  }
 0x182   : > { %v3495_v8 = vpop.permute.xlu1 %3494  ;;  %v3490_v9 = vpop.permute.xlu0 %3489  ;;  %v514_v14 = vsel %vm511_vm2, %v3476_v2, %v3471_v4  ;;  %v686_v15 = vsel %vm685_vm3, %v3481_v7, %v3486_v5  ;;  %v688_v16 = vsel %vm685_vm3, %v3486_v5, %v3481_v7  ;;  %v517_v17 = vpack.c.bf16 %v513_v11, %v512_v10  ;;  %v3636_v2 = vld [vmem:[%s5012_s2 + $0x18] sm:$0xff]   ;;  %v3648_v5 = vld [vmem:[%s5012_s2 + $0xc] sm:$0xff]   ;;  %v3637_v10 = vld [vmem:[%s5012_s2 + $0x20] ss:$0 sps:$4 sm:$0xff]  }
 0x183   : > { %v515_v18 = vsel %vm511_vm2, %v3477_v1, %v3472_v3  ;;  %v3497_v19 = vunpack.i.h.bf16 %v3495_v8  ;;  %v3496_v20 = vunpack.i.l.bf16 %v3495_v8  ;;  %v3492_v21 = vunpack.i.h.bf16 %v3490_v9  ;;  %v4082_v1 = vld [vmem:[%s5014_s4 + $0x4] ss:$16 sps:$4 sm:$0xff]  }
 0x184   : > { %v3491_v22 = vunpack.i.l.bf16 %v3490_v9  ;;  %3148 = vmatprep.subr.msk.bf16.mxu1 %vm548_vm4, %v517_v17  ;;  %v516_v23 = vpack.c.bf16 %v515_v18, %v514_v14  ;;  %v691_v28 = vpack.c.bf16 %v687_v12, %v686_v15  ;;  %v690_v33 = vpack.c.bf16 %v689_v13, %v688_v16  ;;  %v3657_v8 = vld [vmem:[%s5014_s4 + $0x24] ss:$16 sps:$4 sm:$0xff]   ;;  %v3655_v9 = vld [vmem:[%s5014_s4 + $0x20] ss:$16 sps:$4 sm:$0xff]  }
 0x185   : > { %v779_v35 = vsel %vm777_vm5, %v3492_v21, %v3497_v19  ;;  %v781_v53 = vsel %vm777_vm5, %v3497_v19, %v3492_v21  ;;  %v3650_v11 = vld [vmem:[%s5012_s2 + $0x14] ss:$0 sps:$4 sm:$0xff]   ;;  %v3661_v16 = vld [vmem:[%s5014_s4 + $0x60] ss:$16 sps:$4 sm:$0xff]   ;;  %v3638_v17 = vld [vmem:[%s5012_s2 + $0x24] sm:$0xff]  }
 0x186   : > { %v4036_v24 = vpop.permute.xlu1 %3504  ;;  %v4038_v25 = vpop.permute.xlu0 %3499  ;;  %v621_v29 = vsel %vm548_vm4, %v516_v23, 0  ;;  %v778_v36 = vsel %vm777_vm5, %v3491_v22, %v3496_v20  ;;  %v707_v43 = vsel %vm548_vm4, %v690_v33, 0  ;;  %v780_v54 = vsel %vm777_vm5, %v3496_v20, %v3491_v22  ;;  %v3666_v18 = vld [vmem:[%s5014_s4 + $0x84] ss:$16 sps:$4 sm:$0xff]   ;;  %v3664_v21 = vld [vmem:[%s5014_s4 + $0x80] ss:$16 sps:$4 sm:$0xff]  }
 0x187   : > { %627 = vmatpush1.bf16.msra.mxu1 %v621_v29  ;;  %v783_v41 = vpack.c.bf16 %v779_v35, %v778_v36  ;;  %v782_v3 = vpack.c.bf16 %v781_v53, %v780_v54  ;;  %v3507_v12 = vunpack.i.h.bf16 %v4036_v24  ;;  %v3506_v13 = vunpack.i.l.bf16 %v4036_v24  ;;  %v3669_v24 = vld [vmem:[%s5014_s4 + $0xa4] ss:$16 sps:$4 sm:$0xff]  }
 0x188   : > { %3153 = vmatprep.subr.msk.bf16.mxu1 %vm548_vm4, %v691_v28  ;;  %v3502_v14 = vunpack.i.h.bf16 %v4038_v25  ;;  %v3501_v15 = vunpack.i.l.bf16 %v4038_v25  ;;  %v878_v23 = vsel %vm548_vm4, %v861_v57, 0  ;;  %v3667_v25 = vld [vmem:[%s5014_s4 + $0xa0] ss:$16 sps:$4 sm:$0xff]  }
 0x189   : > { %v799_v7 = vsel %vm548_vm4, %v782_v3, 0  ;;  %v3670_v57 = vld [vmem:[%s5014_s4 + $0xc0] ss:$16 sps:$4 sm:$0xff]  }
 0x18a   : > { %v4049_v38 = vpop.permute.xlu1 %3514  ;;  %v4051_v39 = vpop.permute.xlu0 %3509  ;;  %3149 = vmatmul.mubr.msk.bf16.vlgmr.msra.gmra.mrb[0].mxu1 %vm541_vm6, %v3634_v30  ;;  %v952_v19 = vsel %vm948_vm8, %v3507_v12, %v3502_v14  ;;  %v951_v20 = vsel %vm948_vm8, %v3506_v13, %v3501_v15  ;;  %v950_v28 = vsel %vm948_vm8, %v3502_v14, %v3507_v12  ;;  %v949_v29 = vsel %vm948_vm8, %v3501_v15, %v3506_v13  ;;  %v3675_v30 = vld [vmem:[%s5014_s4 + $0xe4] ss:$16 sps:$4 sm:$0xff]  }
 0x18b   : > { %713 = vmatpush1.bf16.msra.mxu1 %v707_v43  ;;  %668 = vmatprep.mubr.bf16.mxu1 %v5019_v0  ;;  %v954_v22 = vpack.c.bf16 %v952_v19, %v951_v20  ;;  %v3517_v33 = vunpack.i.h.bf16 %v4049_v38  ;;  %v3516_v35 = vunpack.i.l.bf16 %v4049_v38  ;;  %v3512_v36 = vunpack.i.h.bf16 %v4051_v39  ;;  %v3673_v43 = vld [vmem:[%s5014_s4 + $0xe0] ss:$16 sps:$4 sm:$0xff]   ;;  %v4195_v38 = vld [vmem:[%s5014_s4 + $0x104] ss:$16 sps:$4 sm:$0xff]  }
 0x18c   : > { %3158 = vmatprep.subr.msk.bf16.mxu1 %vm548_vm4, %v783_v41  ;;  %v3511_v41 = vunpack.i.l.bf16 %v4051_v39  ;;  %v3646_v19 = vld [vmem:[%s5012_s2 + $0x54] sm:$0xff]  }
 0x18d   : > { %v1044_v39 = vsel %vm5025_vm9, %v3517_v33, %v3512_v36  ;;  %v1042_v53 = vsel %vm5025_vm9, %v3512_v36, %v3517_v33  ;;  %v4329_v33 = vld [vmem:[%s5014_s4 + $0x180] ss:$16 sps:$4 sm:$0xff]  }
 0x18e   : > { %v4056_v44 = vpop.permute.xlu1 %3524  ;;  %v4058_v45 = vpop.permute.xlu0 %3519  ;;  %v1041_v54 = vsel %vm5025_vm9, %v3511_v41, %v3516_v35  ;;  %v4341_v36 = vld [vmem:[%s5014_s4 + $0x1a0] ss:$16 sps:$4 sm:$0xff]  }
 0x192   : > { %v3535_v47 = vpop.permute.xlu1 %3534  ;;  %v3530_v48 = vpop.permute.xlu0 %3529  ;;  %3150 = vmatmul.mubr.msk.bf16.gmra.mrb[4].mxu1 %vm541_vm6, %v3635_v46  ;;  %v3640_v46 = vld [vmem:[%s5012_s2 + $0x30] sm:$0xff]  }
 0x193   : > { %v3537_v49 = vunpack.i.h.bf16 %v3535_v47  ;;  %v3536_v50 = vunpack.i.l.bf16 %v3535_v47  ;;  %v3532_v51 = vunpack.i.h.bf16 %v3530_v48  ;;  %v3531_v52 = vunpack.i.l.bf16 %v3530_v48  ;;  %744 = vmatprep.mubr.bf16.mxu1 %v5019_v0 }
 0x194   : > { %v953_v47 = vpack.c.bf16 %v950_v28, %v949_v29  ;;  %v1043_v48 = vsel %vm5025_vm9, %v3516_v35, %v3511_v41  ;;  %v4312_v28 = vld [vmem:[%s5014_s4 + $0x164] ss:$16 sps:$4 sm:$0xff]   ;;  %v4317_v29 = vld [vmem:[%s5014_s4 + $0x160] ss:$16 sps:$4 sm:$0xff]  }
 0x195   : > { %v528_v55 = vsel %vm526_vm7, %v3532_v51, %v3537_v49  ;;  %v530_v58 = vsel %vm526_vm7, %v3537_v49, %v3532_v51  ;;  %v527_v59 = vsel %vm526_vm7, %v3531_v52, %v3536_v50  ;;  %v529_v61 = vsel %vm526_vm7, %v3536_v50, %v3531_v52  ;;  %v3676_v49 = vld [vmem:[%s5014_s4 + $0x100] ss:$16 sps:$4 sm:$0xff]   ;;  %v3641_v52 = vld [vmem:[%s5012_s2 + $0x38] ss:$0 sps:$4 sm:$0xff]   ;;  %v4336_v35 = vld [vmem:[%s5014_s4 + $0x1a4] ss:$16 sps:$4 sm:$0xff]  }
 0x196   : > { %v532_v62 = vpack.c.bf16 %v528_v55, %v527_v59  ;;  %v531_v63 = vpack.c.bf16 %v530_v58, %v529_v61  ;;  %v1046_v50 = vpack.c.bf16 %v1044_v39, %v1043_v48  ;;  %v970_v51 = vsel %vm548_vm4, %v953_v47, 0  ;;  %v4348_v41 = vld [vmem:[%s5014_s4 + $0x1c4] ss:$16 sps:$4 sm:$0xff]   ;;  %v4365_v47 = vld [vmem:[%s5014_s4 + $0x1e0] ss:$16 sps:$4 sm:$0xff]  }
 0x197   : > { %v3527_v55 = vunpack.i.h.bf16 %v4056_v44  ;;  %v3526_v58 = vunpack.i.l.bf16 %v4056_v44  ;;  %v3522_v59 = vunpack.i.h.bf16 %v4058_v45  ;;  %v3521_v61 = vunpack.i.l.bf16 %v4058_v45  ;;  %v4372_v39 = vld [vmem:[%s5014_s4 + $0xc] ss:$16 sps:$4 sm:$0xff]  }
 0x198   : > { %3143 = vmatprep.subr.msk.bf16.mxu0 %vm548_vm4, %v532_v62  ;;  %v550_v4 = vsel %vm548_vm4, %v531_v63, 0  ;;  %v3642_v62 = vld [vmem:[%s5012_s2 + $0x3c] sm:$0xff]   ;;  %v1045_v63 = vpack.c.bf16 %v1042_v53, %v1041_v54 }
 0x199   : > { %556 = vmatpush1.bf16.msra.mxu0 %v550_v4  ;;  %v1135_v3 = vsel %vm5018_vm10, %v3526_v58, %v3521_v61  ;;  %v3643_v4 = vld [vmem:[%s5012_s2 + $0x44] ss:$0 sps:$4 sm:$0xff]  }
 0x19a   : > { %1662 = vmatprep.subr.bf16.mxu0 %v4082_v1  ;;  %3154 = vmatmul.mubr.msk.bf16.vlgmr.msra.gmra.mrb[0].mxu1 %vm541_vm6, %v3636_v2  ;;  %v1136_v2 = vsel %vm5018_vm10, %v3527_v55, %v3522_v59  ;;  %v1062_v45 = vsel %vm548_vm4, %v1045_v63, 0 }
 0x19b   : > { %805 = vmatpush1.bf16.msra.mxu1 %v799_v7  ;;  %754 = vmatprep.mubr.bf16.mxu1 %v5019_v0  ;;  %v1138_v44 = vpack.c.bf16 %v1136_v2, %v1135_v3  ;;  %v1134_v7 = vsel %vm5018_vm10, %v3522_v59, %v3527_v55 }
 0x19c   : > { %3144 = vmatmul.mubr.msk.bf16.vlgmr.msra.gmra.mrb[4].mxu0 %vm541_vm6, %v3648_v5  ;;  %3163 = vmatprep.subr.msk.bf16.mxu1 %vm548_vm4, %v862_v56  ;;  %v3663_v56 = vld [vmem:[%s5014_s4 + $0x64] ss:$16 sps:$4 sm:$0xff]   ;;  %v3545_v5 = vpop.permute.xlu1 %3544 }
 0x19d   : > { %597 = vmatprep.mubr.bf16.mxu0 %v5019_v0  ;;  %1663 = vmatpush1.bf16.msra.mxu0 %v3652_v6  ;;  %v3540_v6 = vpop.permute.xlu0 %3539 }
 0x19e   : > { %1664 = vmatprep.subr.bf16.mxu0 %v3657_v8  ;;  %v1133_v8 = vsel %vm5018_vm10, %v3521_v61, %v3526_v58 }
 0x1a1   : > { %1665 = vmatpush1.bf16.msra.mxu0 %v3655_v9  ;;  %v3547_v9 = vunpack.i.h.bf16 %v3545_v5 }
 0x1a2   : > { %3155 = vmatmul.mubr.msk.bf16.gmra.mrb[4].mxu1 %vm541_vm6, %v3637_v10  ;;  %1666 = vmatprep.subr.bf16.mxu0 %v3660_v37  ;;  %v3546_v10 = vunpack.i.l.bf16 %v3545_v5  ;;  %v3541_v37 = vunpack.i.l.bf16 %v3540_v6 }
 0x1a3   : > { %836 = vmatprep.mubr.bf16.mxu1 %v5019_v0 }
 0x1a4   : > { %3145 = vmatmul.mubr.msk.bf16.gmra.mrb[8].mxu0 %vm541_vm6, %v3650_v11  ;;  %v3542_v11 = vunpack.i.h.bf16 %v3540_v6  ;;  %v1227_v13 = vsel %vm5017_vm11, %v3546_v10, %v3541_v37 }
 0x1a5   : > { %1667 = vmatpush1.bf16.msra.mxu0 %v3658_v42  ;;  %v3644_v42 = vld [vmem:[%s5012_s2 + $0x48] sm:$0xff]  }
 0x1a6   : > { %1668 = vmatprep.subr.bf16.mxu0 %v3663_v56  ;;  %v1137_v56 = vpack.c.bf16 %v1134_v7, %v1133_v8  ;;  %v1228_v12 = vsel %vm5017_vm11, %v3547_v9, %v3542_v11 }
 0x1a7   : > { %v1230_v14 = vpack.c.bf16 %v1228_v12, %v1227_v13 }
 0x1a8   : > { %v1154_v15 = vsel %vm548_vm4, %v1137_v56, 0 }
 0x1a9   : > { %1669 = vmatpush1.bf16.msra.mxu0 %v3661_v16  ;;  %v3645_v16 = vld [vmem:[%s5012_s2 + $0x50] ss:$0 sps:$4 sm:$0xff]  }
 0x1aa   : > { %3159 = vmatmul.mubr.msk.bf16.vlgmr.msra.gmra.mrb[0].mxu1 %vm541_vm6, %v3638_v17  ;;  %1670 = vmatprep.subr.bf16.mxu0 %v3666_v18  ;;  %v1226_v17 = vsel %vm5017_vm11, %v3542_v11, %v3547_v9  ;;  %v1225_v18 = vsel %vm5017_vm11, %v3541_v37, %v3546_v10 }
 0x1ab   : > { %884 = vmatpush1.bf16.msra.mxu1 %v878_v23  ;;  %846 = vmatprep.mubr.bf16.mxu1 %v5019_v0  ;;  %v1229_v20 = vpack.c.bf16 %v1226_v17, %v1225_v18  ;;  %v4278_v23 = vld [vmem:[%s5014_s4 + $0x124] ss:$16 sps:$4 sm:$0xff]  }
 0x1ac   : > { %3168 = vmatprep.subr.msk.bf16.mxu1 %vm548_vm4, %v954_v22  ;;  %v4273_v22 = vld [vmem:[%s5014_s4 + $0x120] ss:$16 sps:$4 sm:$0xff]  }
 0x1ad   : > { %1671 = vmatpush1.bf16.msra.mxu0 %v3664_v21  ;;  %v1246_v21 = vsel %vm548_vm4, %v1229_v20, 0 }
 0x1ae   : > { %1672 = vmatprep.subr.bf16.mxu0 %v3669_v24  ;;  %v3647_v24 = vld [vmem:[%s5012_s2 + $0x5c] ss:$0 sps:$4 sm:$0xff]  }
 0x1b1   : > { %1673 = vmatpush1.bf16.msra.mxu0 %v3667_v25  ;;  %v3649_v25 = vld [vmem:[%s5012_s2 + $0x60] sm:$0xff]  }
 0x1b2   : > { %3160 = vmatmul.mubr.msk.bf16.gmra.mrb[4].mxu1 %vm541_vm6, %v3639_v34  ;;  %1674 = vmatprep.subr.bf16.mxu0 %v3672_v40  ;;  %v3651_v34 = vld [vmem:[%s5012_s2 + $0x68] ss:$0 sps:$4 sm:$0xff]   ;;  %v4300_v40 = vld [vmem:[%s5014_s4 + $0x144] ss:$16 sps:$4 sm:$0xff]  }
 0x1b3   : > { %915 = vmatprep.mubr.bf16.mxu1 %v5019_v0 }
 0x1b5   : > { %1675 = vmatpush1.bf16.msra.mxu0 %v3670_v57  ;;  %v4305_v57 = vld [vmem:[%s5014_s4 + $0x140] ss:$16 sps:$4 sm:$0xff]  }
 0x1b6   : > { %1676 = vmatprep.subr.bf16.mxu0 %v3675_v30  ;;  %v4324_v30 = vld [vmem:[%s5014_s4 + $0x184] ss:$16 sps:$4 sm:$0xff]  }
 0x1b9   : > { %1677 = vmatpush1.bf16.msra.mxu0 %v3673_v43  ;;  %v4353_v43 = vld [vmem:[%s5014_s4 + $0x1c0] ss:$16 sps:$4 sm:$0xff]  }
 0x1ba   : > { %3164 = vmatmul.mubr.msk.bf16.vlgmr.msra.gmra.mrb[0].mxu1 %vm541_vm6, %v3640_v46  ;;  %1678 = vmatprep.subr.bf16.mxu0 %v4195_v38  ;;  %v4360_v46 = vld [vmem:[%s5014_s4 + $0x1e4] ss:$16 sps:$4 sm:$0xff]  }
 0x1bb   : > { %976 = vmatpush1.bf16.msra.mxu1 %v970_v51  ;;  %925 = vmatprep.mubr.bf16.mxu1 %v5019_v0 }
 0x1bc   : > { %3173 = vmatprep.subr.msk.bf16.mxu1 %vm548_vm4, %v1046_v50 }
 0x1bd   : > { %1679 = vmatpush1.bf16.msra.mxu0 %v3676_v49 }
 0x1be   : > { %1680 = vmatprep.subr.bf16.mxu0 %v4278_v23 }
 0x1c1   : > { %1681 = vmatpush1.bf16.msra.mxu0 %v4273_v22 }
 0x1c2   : > { %3165 = vmatmul.mubr.msk.bf16.gmra.mrb[4].mxu1 %vm541_vm6, %v3641_v52  ;;  %1682 = vmatprep.subr.bf16.mxu0 %v4300_v40 }
 0x1c3   : > { %1007 = vmatprep.mubr.bf16.mxu1 %v5019_v0 }
 0x1c5   : > { %1683 = vmatpush1.bf16.msra.mxu0 %v4305_v57 }
 0x1c6   : > { %1684 = vmatprep.subr.bf16.mxu0 %v4312_v28 }
 0x1c9   : > { %1685 = vmatpush1.bf16.msra.mxu0 %v4317_v29 }
 0x1ca   : > { %3169 = vmatmul.mubr.msk.bf16.vlgmr.msra.gmra.mrb[0].mxu1 %vm541_vm6, %v3642_v62  ;;  %1686 = vmatprep.subr.bf16.mxu0 %v4324_v30 }
 0x1cb   : > { %1068 = vmatpush1.bf16.msra.mxu1 %v1062_v45  ;;  %1017 = vmatprep.mubr.bf16.mxu1 %v5019_v0 }
 0x1cc   : > { %3178 = vmatprep.subr.msk.bf16.mxu1 %vm548_vm4, %v1138_v44 }
 0x1cd   : > { %1687 = vmatpush1.bf16.msra.mxu0 %v4329_v33 }
 0x1ce   : > { %1688 = vmatprep.subr.bf16.mxu0 %v4336_v35 }
 0x1d1   : > { %1689 = vmatpush1.bf16.msra.mxu0 %v4341_v36 }
 0x1d2   : > { %3170 = vmatmul.mubr.msk.bf16.gmra.mrb[4].mxu1 %vm541_vm6, %v3643_v4  ;;  %1690 = vmatprep.subr.bf16.mxu0 %v4348_v41 }
 0x1d3   : > { %1099 = vmatprep.mubr.bf16.mxu1 %v5019_v0 }
 0x1d5   : > { %1691 = vmatpush1.bf16.msra.mxu0 %v4353_v43 }
 0x1d6   : > { %1692 = vmatprep.subr.bf16.mxu0 %v4360_v46 }
 0x1d9   : > { %1693 = vmatpush1.bf16.msra.mxu0 %v4365_v47 }
 0x1da   : > { %3174 = vmatmul.mubr.msk.bf16.vlgmr.msra.gmra.mrb[0].mxu1 %vm541_vm6, %v3644_v42  ;;  %1713 = vmatprep.subr.bf16.mxu0 %v4372_v39 }
 0x1db   : > { %1160 = vmatpush1.bf16.msra.mxu1 %v1154_v15  ;;  %1109 = vmatprep.mubr.bf16.mxu1 %v5019_v0 }
 0x1dc   : > { %3183 = vmatprep.subr.msk.bf16.mxu1 %vm548_vm4, %v1230_v14 }
 0x1e2   : > { %3175 = vmatmul.mubr.msk.bf16.gmra.mrb[4].mxu1 %vm541_vm6, %v3645_v16 }
 0x1e3   : > { %1191 = vmatprep.mubr.bf16.mxu1 %v5019_v0 }
 0x1ea   : > { %3179 = vmatmul.mubr.msk.bf16.vlgmr.msra.gmra.mrb[0].mxu1 %vm541_vm6, %v3646_v19 }
 0x1eb   : > { %1252 = vmatpush1.bf16.msra.mxu1 %v1246_v21  ;;  %1201 = vmatprep.mubr.bf16.mxu1 %v5019_v0 }
 0x1f2   : > { %3180 = vmatmul.mubr.msk.bf16.gmra.mrb[4].mxu1 %vm541_vm6, %v3647_v24 }
 0x1f3   : > { %1283 = vmatprep.mubr.bf16.mxu1 %v5019_v0 }
 0x1fa   : > { %3184 = vmatmul.mubr.msk.bf16.vlgmr.msra.gmra.mrb[0].mxu1 %vm541_vm6, %v3649_v25 }
 0x1fb   : > { %1293 = vmatprep.mubr.bf16.mxu1 %v5019_v0 }
 0x202   : > { %3185 = vmatmul.mubr.msk.bf16.gmra.mrb[4].mxu1 %vm541_vm6, %v3651_v34 }
 0x203   : > { %1904 = vmatprep.mubr.bf16.mxu1 %v5019_v0 }
 0x26f   : > { %v589_v48 = vpop.f32.mrb[4].mxu0 }
 0x270   : > { %v591_v49 = vpop.f32.mrb[5].mxu0 }
 0x271   : > { %v593_v50 = vpop.f32.mrb[6].mxu0 }
 0x272   : > { %v595_v51 = vpop.f32.mrb[7].mxu0 }
 0x277   : > { %v599_v52 = vpop.f32.mrb[8].mxu0 }
 0x278   : > { %v601_v53 = vpop.f32.mrb[9].mxu0 }
 0x279   : > { %v603_v54 = vpop.f32.mrb[10].mxu0 }
 0x27a   : > { %v604_v55 = vpop.f32.mrb[11].mxu0  ;;  %v3700_v54 = vld [vmem:[%s5014_s4 + $0x8] ss:$16 sps:$4 sm:$0xff]  }
 0x2cd   : > { %v1285_v58 = vpop.f32.mrb[0].mxu1 }
 0x2ce   : > { %v3323_v59 = vadd.f32 %v1285_v58, %v589_v48  ;;  %v1287_v61 = vpop.f32.mrb[1].mxu1 }
 0x2cf   : > { %v3324_v62 = vadd.f32 %v1287_v61, %v591_v49  ;;  %v1289_v63 = vpop.f32.mrb[2].mxu1 }
 0x2d0   : > { %v1314_v2 = vmul.f32 0.70710677, %v3323_v59  ;;  %v3325_v3 = vadd.f32 %v1289_v63, %v593_v50  ;;  %v1291_v44 = vpop.f32.mrb[3].mxu1  ;;  %v1308_v18 = vmul.f32 0.5, %v3323_v59  ;;  %v3705_v59 = vld [vmem:[%s5014_s4 + $0x2c] ss:$16 sps:$4 sm:$0xff]  }
 0x2d1   : > { %v1315_v45 = vmul.f32 0.70710677, %v3324_v62  ;;  %v3326_v4 = vadd.f32 %v1291_v44, %v595_v51  ;;  %v1309_v21 = vmul.f32 0.5, %v3324_v62  ;;  %v3708_v44 = vld [vmem:[%s5014_s4 + $0x4c] ss:$16 sps:$4 sm:$0xff]  }
 0x2d2   : > { %3766 = verf.f32 %v1314_v2  ;;  %v1316_v5 = vmul.f32 0.70710677, %v3325_v3  ;;  %v1310_v19 = vmul.f32 0.5, %v3325_v3  ;;  %v3703_v2 = vld [vmem:[%s5014_s4 + $0x28] ss:$16 sps:$4 sm:$0xff]  }
 0x2d3   : > { %3768 = verf.f32 %v1315_v45  ;;  %v1317_v6 = vmul.f32 0.70710677, %v3326_v4  ;;  %v1311_v24 = vmul.f32 0.5, %v3326_v4 }
 0x2d4   : > { %3770 = verf.f32 %v1316_v5  ;;  %v3706_v5 = vld [vmem:[%s5014_s4 + $0x48] ss:$16 sps:$4 sm:$0xff]  }
 0x2d5   : > { %3772 = verf.f32 %v1317_v6  ;;  %v1295_v7 = vpop.f32.mrb[4].mxu1 }
 0x2d6   : > { %v3327_v8 = vadd.f32 %v1295_v7, %v599_v52  ;;  %v1297_v9 = vpop.f32.mrb[5].mxu1  ;;  %v3711_v7 = vld [vmem:[%s5014_s4 + $0x6c] ss:$16 sps:$4 sm:$0xff]  }
 0x2d7   : > { %v3328_v10 = vadd.f32 %v1297_v9, %v601_v53  ;;  %v1299_v11 = vpop.f32.mrb[6].mxu1  ;;  %v3714_v9 = vld [vmem:[%s5014_s4 + $0x8c] ss:$16 sps:$4 sm:$0xff]  }
 0x2d8   : > { %v1318_v37 = vmul.f32 0.70710677, %v3327_v8  ;;  %v1300_v42 = vpop.f32.mrb[7].mxu1  ;;  %v1312_v63 = vmul.f32 0.5, %v3327_v8  ;;  %v3709_v8 = vld [vmem:[%s5014_s4 + $0x68] ss:$16 sps:$4 sm:$0xff]  }
 0x2d9   : > { %v1319_v56 = vmul.f32 0.70710677, %v3328_v10  ;;  %v1313_v61 = vmul.f32 0.5, %v3328_v10  ;;  %v3712_v10 = vld [vmem:[%s5014_s4 + $0x88] ss:$16 sps:$4 sm:$0xff]  }
 0x2da   : > { %3774 = verf.f32 %v1318_v37  ;;  %v3717_v11 = vld [vmem:[%s5014_s4 + $0xac] ss:$16 sps:$4 sm:$0xff]   ;;  %v3715_v37 = vld [vmem:[%s5014_s4 + $0xa8] ss:$16 sps:$4 sm:$0xff]  }
 0x2db   : > { %3776 = verf.f32 %v1319_v56  ;;  %v3720_v42 = vld [vmem:[%s5014_s4 + $0xcc] ss:$16 sps:$4 sm:$0xff]   ;;  %v3718_v56 = vld [vmem:[%s5014_s4 + $0xc8] ss:$16 sps:$4 sm:$0xff]  }
 0x2dc   : > { %v3767_v12 = vpop.eup %3766 }
 0x2dd   : > { %v3769_v13 = vpop.eup %3768  ;;  %v1326_v14 = vadd.f32 1.0, %v3767_v12  ;;  %v4426_v12 = vld [vmem:[%s5014_s4 + $0xec] ss:$16 sps:$4 sm:$0xff]  }
 0x2de   : > { %v3771_v15 = vpop.eup %3770  ;;  %v1327_v16 = vadd.f32 1.0, %v3769_v13  ;;  %v4431_v13 = vld [vmem:[%s5014_s4 + $0xe8] ss:$16 sps:$4 sm:$0xff]  }
 0x2df   : > { %v3773_v17 = vpop.eup %3772  ;;  %v1328_v20 = vadd.f32 1.0, %v3771_v15  ;;  %v1332_v34 = vmul.f32 %v1326_v14, %v1308_v18  ;;  %v4437_v14 = vld [vmem:[%s5014_s4 + $0x10c] ss:$16 sps:$4 sm:$0xff]   ;;  %v4443_v15 = vld [vmem:[%s5014_s4 + $0x108] ss:$16 sps:$4 sm:$0xff]  }
 0x2e0   : > { %v1329_v25 = vadd.f32 1.0, %v3773_v17  ;;  %v1333_v49 = vmul.f32 %v1327_v16, %v1309_v21  ;;  %v4449_v16 = vld [vmem:[%s5014_s4 + $0x12c] ss:$16 sps:$4 sm:$0xff]   ;;  %v4455_v17 = vld [vmem:[%s5014_s4 + $0x128] ss:$16 sps:$4 sm:$0xff]  }
 0x2e1   : > { %v1334_v48 = vmul.f32 %v1328_v20, %v1310_v19  ;;  %v4461_v18 = vld [vmem:[%s5014_s4 + $0x14c] ss:$16 sps:$4 sm:$0xff]   ;;  %v4467_v19 = vld [vmem:[%s5014_s4 + $0x148] ss:$16 sps:$4 sm:$0xff]  }
 0x2e2   : > { %v1335_v50 = vmul.f32 %v1329_v25, %v1311_v24  ;;  %v4473_v20 = vld [vmem:[%s5014_s4 + $0x16c] ss:$16 sps:$4 sm:$0xff]   ;;  %v4479_v21 = vld [vmem:[%s5014_s4 + $0x168] ss:$16 sps:$4 sm:$0xff]  }
 0x2e3   : > { %v4375_v51 = vpack.c.bf16 %v1334_v48, %v1332_v34  ;;  %v4485_v24 = vld [vmem:[%s5014_s4 + $0x18c] ss:$16 sps:$4 sm:$0xff]   ;;  %v4491_v25 = vld [vmem:[%s5014_s4 + $0x188] ss:$16 sps:$4 sm:$0xff]  }
 0x2e4   : > { %v3775_v52 = vpop.eup %3774  ;;  %v1339_v53 = vpack.c.bf16 %v1335_v50, %v1333_v49  ;;  %5030 = vst [vmem:[#allocation2_spill] sm:$0xff] %v4485_v24  ;;  %5031 = vst [vmem:[#allocation3_spill] sm:$0xff] %v4491_v25  ;;  %v4497_v34 = vld [vmem:[%s5014_s4 + $0x1ac] ss:$16 sps:$4 sm:$0xff]   ;;  %v4503_v48 = vld [vmem:[%s5014_s4 + $0x1a8] ss:$16 sps:$4 sm:$0xff]  }
 0x2e5   : > { %v3777_v55 = vpop.eup %3776  ;;  %v1330_v58 = vadd.f32 1.0, %v3775_v52  ;;  %5032 = vst [vmem:[#allocation4_spill] sm:$0xff] %v4497_v34  ;;  %5033 = vst [vmem:[#allocation5_spill] sm:$0xff] %v4503_v48  ;;  %v4509_v49 = vld [vmem:[%s5014_s4 + $0x1cc] ss:$16 sps:$4 sm:$0xff]  }
 0x2e6   : > { %v1331_v62 = vadd.f32 1.0, %v3777_v55  ;;  %1694 = vmatprep.mubr.bf16.mxu0 %v1339_v53  ;;  %5034 = vst [vmem:[#allocation6_spill] sm:$0xff] %v4509_v49  ;;  %v4515_v50 = vld [vmem:[%s5014_s4 + $0x1c8] ss:$16 sps:$4 sm:$0xff]   ;;  %v4521_v52 = vld [vmem:[%s5014_s4 + $0x1ec] ss:$16 sps:$4 sm:$0xff]  }
 0x2e7   : > { %1695 = vmatmul.mubr.bf16.vlgmr.msra.gmra.mrb[12].mxu0 %v4375_v51  ;;  %v1336_v45 = vmul.f32 %v1330_v58, %v1312_v63  ;;  %5035 = vst [vmem:[#allocation7_spill] sm:$0xff] %v4515_v50  ;;  %5036 = vst [vmem:[#allocation8_spill] sm:$0xff] %v4521_v52  ;;  %v3263_v55 = vld [vmem:[%s3938_s27 + $0x28] sm:$0xff]  ;;  %v3748_v58 = vld [vmem:[%s3938_s27 + $0x18] ss:$8 sps:$4 sm:$0xff]  }
 0x2e8   : > { %1714 = vmatpush1.bf16.msra.mxu0 %v3700_v54  ;;  %v1337_v3 = vmul.f32 %v1331_v62, %v1313_v61  ;;  %v3750_v54 = vld [vmem:[%s3938_s27 + $0x1c] ss:$8 sps:$4 sm:$0xff]   ;;  %v3266_v61 = vcombine.low %v3263_v55, %v3263_v55 }
 0x2e9   : > { %1715 = vmatprep.subr.bf16.mxu0 %v3705_v59  ;;  %v4396_v6 = vpack.c.bf16 %v1336_v45, %v1336_v45  ;;  %v3267_v59 = vcombine.high %v3263_v55, %v3263_v55  ;;  %v3822_v63 = vld [vmem:[%s5011_s1] sm:$0x3f]  }
 0x2ea   : > { %v4390_v4 = vpack.c.bf16 %v1337_v3, %v1337_v3  ;;  %v1991_v62 = vsel %vm401_vm0, %v3266_v61, 0 }
 0x2ec   : > { %1716 = vmatpush1.bf16.msra.mxu0 %v3703_v2  ;;  %1704 = vmatprep.mubr.bf16.mxu0 %v4390_v4 }
 0x2ed   : > { %1717 = vmatprep.subr.bf16.mxu0 %v3708_v44 }
 0x2ef   : > { %1705 = vmatmul.mubr.bf16.gmra.mrb[16].mxu0 %v4396_v6 }
 0x2f0   : > { %1718 = vmatpush1.bf16.msra.mxu0 %v3706_v5  ;;  %1745 = vmatprep.mubr.bf16.mxu0 %v1339_v53  ;;  %v4527_v53 = vld [vmem:[%s5014_s4 + $0x1e8] ss:$16 sps:$4 sm:$0xff]  }
 0x2f1   : > { %1719 = vmatprep.subr.bf16.mxu0 %v3711_v7  ;;  %5037 = vst [vmem:[#allocation9_spill] sm:$0xff] %v4527_v53 }
 0x2f4   : > { %1720 = vmatpush1.bf16.msra.mxu0 %v3709_v8 }
 0x2f5   : > { %1721 = vmatprep.subr.bf16.mxu0 %v3714_v9 }
 0x2f8   : > { %1722 = vmatpush1.bf16.msra.mxu0 %v3712_v10 }
 0x2f9   : > { %1723 = vmatprep.subr.bf16.mxu0 %v3717_v11 }
 0x2fc   : > { %1724 = vmatpush1.bf16.msra.mxu0 %v3715_v37 }
 0x2fd   : > { %1725 = vmatprep.subr.bf16.mxu0 %v3720_v42 }
 0x300   : > { %1726 = vmatpush1.bf16.msra.mxu0 %v3718_v56 }
 0x301   : > { %1727 = vmatprep.subr.bf16.mxu0 %v4426_v12 }
 0x304   : > { %1728 = vmatpush1.bf16.msra.mxu0 %v4431_v13 }
 0x305   : > { %1729 = vmatprep.subr.bf16.mxu0 %v4437_v14 }
 0x308   : > { %1730 = vmatpush1.bf16.msra.mxu0 %v4443_v15 }
 0x309   : > { %1731 = vmatprep.subr.bf16.mxu0 %v4449_v16 }
 0x30c   : > { %1732 = vmatpush1.bf16.msra.mxu0 %v4455_v17 }
 0x30d   : > { %1733 = vmatprep.subr.bf16.mxu0 %v4461_v18 }
 0x310   : > { %1734 = vmatpush1.bf16.msra.mxu0 %v4467_v19 }
 0x311   : > { %1735 = vmatprep.subr.bf16.mxu0 %v4473_v20 }
 0x314   : > { %1736 = vmatpush1.bf16.msra.mxu0 %v4479_v21 }
 0x315   : > { %1737 = vmatprep.subr.bf16.mxu0 %v4485_v24 }
 0x318   : > { %1738 = vmatpush1.bf16.msra.mxu0 %v4491_v25 }
 0x319   : > { %1739 = vmatprep.subr.bf16.mxu0 %v4497_v34 }
 0x31c   : > { %1740 = vmatpush1.bf16.msra.mxu0 %v4503_v48 }
 0x31d   : > { %1741 = vmatprep.subr.bf16.mxu0 %v4509_v49 }
 0x320   : > { %1742 = vmatpush1.bf16.msra.mxu0 %v4515_v50 }
 0x321   : > { %1743 = vmatprep.subr.bf16.mxu0 %v4521_v52 }
 0x324   : > { %1744 = vmatpush1.bf16.msra.mxu0 %v4527_v53 }
 0x325   : > { %1996 = vmatprep.subr.bf16.mxu0 %v3750_v54 }
 0x327   : > { %1746 = vmatmul.mubr.bf16.vlgmr.msra.gmra.mrb[20].mxu0 %v4375_v51 }
 0x328   : > { %1755 = vmatprep.mubr.bf16.mxu0 %v4390_v4  ;;  %1997 = vmatpush1.bf16.msra.mxu0 %v3748_v58 }
 0x329   : > { %3268 = vmatprep.subr.msk.bf16.mxu0 %vm401_vm0, %v3267_v59 }
 0x32c   : > { %1999 = vmatpush1.bf16.msra.mxu0 %v1991_v62 }
 0x32f   : > { %1756 = vmatmul.mubr.bf16.gmra.mrb[24].mxu0 %v4396_v6 }
 0x330   : > { %2028 = vmatprep.mubr.bf16.mxu0 %v5019_v0 }
 0x337   : > { %3269 = vmatmul.mubr.msk.bf16.vlgmr.msra.gmra.mrb[28].mxu0 %vm397_vm1, %v3822_v63 }
 0x338   : > { %2133 = vmatprep.mubr.bf16.mxu0 %v5019_v0 }
 0x3ba   : > { %v1696_v51 = vpop.f32.mrb[12].mxu0 }
 0x3bb   : > { %v1698_v2 = vpop.f32.mrb[13].mxu0  ;;  %v1764_v6 = vmul.f32 %v1696_v51, %v1696_v51 }
 0x3bc   : > { %v1700_v3 = vpop.f32.mrb[14].mxu0  ;;  %v1765_v11 = vmul.f32 %v1698_v2, %v1698_v2 }
 0x3bd   : > { %v1702_v44 = vpop.f32.mrb[15].mxu0  ;;  %v1766_v56 = vmul.f32 %v1700_v3, %v1700_v3 }
 0x3be   : > { %v1767_v59 = vmul.f32 %v1702_v44, %v1702_v44 }
 0x3c2   : > { %v1706_v45 = vpop.f32.mrb[16].mxu0 }
 0x3c3   : > { %v1708_v4 = vpop.f32.mrb[17].mxu0 }
 0x3c4   : > { %v1710_v5 = vpop.f32.mrb[18].mxu0 }
 0x3c5   : > { %v1711_v7 = vpop.f32.mrb[19].mxu0 }
 0x3c6   : > { %v1768_v7 = vmul.f32 %v1706_v45, %v1706_v45 }
 0x3fa   : > { %v1747_v8 = vpop.f32.mrb[20].mxu0 }
 0x3fb   : > { %v1770_v9 = vmul.f32 %v1747_v8, %v1747_v8  ;;  %v1749_v10 = vpop.f32.mrb[21].mxu0 }
 0x3fc   : > { %v1771_v37 = vmul.f32 %v1749_v10, %v1749_v10  ;;  %v1751_v42 = vpop.f32.mrb[22].mxu0  ;;  %v1769_v10 = vmul.f32 %v1708_v4, %v1708_v4 }
 0x3fd   : > { %v1776_v54 = vadd.f32 %v1770_v9, %v1764_v6  ;;  %v1772_v55 = vmul.f32 %v1751_v42, %v1751_v42  ;;  %v1753_v58 = vpop.f32.mrb[23].mxu0 }
 0x3fe   : > { %v4545_v61 = vadd.f32 %v1771_v37, %v1765_v11  ;;  %v1773_v62 = vmul.f32 %v1753_v58, %v1753_v58 }
 0x3ff   : > { %3778 = vrsqrt.f32 %v1776_v54  ;;  %v1778_v63 = vadd.f32 %v1772_v55, %v1766_v56  ;;  %vm1784_vm12 = vcmp.eq.f32.partialorder %v1776_v54, inf  ;;  %vm1786_vm13 = vcmp.eq.f32.partialorder %v1776_v54, 0.0 }
 0x400   : > { %3780 = vrsqrt.f32 %v4545_v61  ;;  %v1779_v5 = vadd.f32 %v1773_v62, %v1767_v59  ;;  %vm1791_vm14 = vcmp.eq.f32.partialorder %v4545_v61, inf  ;;  %v1794_v4 = vand.u32 2147483648, %v4545_v61 }
 0x401   : > { %3782 = vrsqrt.f32 %v1778_v63  ;;  %vm1798_vm15 = vcmp.eq.f32.partialorder %v1778_v63, inf  ;;  %vm1800_vm10 = vcmp.eq.f32.partialorder %v1778_v63, 0.0  ;;  %vm1793_vm9 = vcmp.eq.f32.partialorder %v4545_v61, 0.0 }
 0x402   : > { %3784 = vrsqrt.f32 %v1779_v5  ;;  %v1757_v51 = vpop.f32.mrb[24].mxu0  ;;  %vm1805_vm11 = vcmp.eq.f32.partialorder %v1779_v5, inf }
 0x403   : > { %v1774_v2 = vmul.f32 %v1757_v51, %v1757_v51  ;;  %v1759_v8 = vpop.f32.mrb[25].mxu0 }
 0x404   : > { %v1775_v3 = vmul.f32 %v1759_v8, %v1759_v8  ;;  %v1761_v6 = vpop.f32.mrb[26].mxu0  ;;  %v1787_v8 = vand.u32 2147483648, %v1776_v54 }
 0x405   : > { %v1780_v9 = vadd.f32 %v1774_v2, %v1768_v7  ;;  %v1762_v42 = vpop.f32.mrb[27].mxu0 }
 0x406   : > { %v1781_v44 = vadd.f32 %v1775_v3, %v1769_v10 }
 0x407   : > { %3786 = vrsqrt.f32 %v1780_v9 }
 0x408   : > { %3788 = vrsqrt.f32 %v1781_v44 }
 0x409   : > { %v3779_v11 = vpop.eup %3778 }
 0x40a   : > { %v3781_v37 = vpop.eup %3780  ;;  %v2030_v56 = vpop.f32.mrb[28].mxu0  ;;  %v1783_v55 = vmul.f32 %v3779_v11, %v1776_v54 }
 0x40b   : > { %v3783_v58 = vpop.eup %3782  ;;  %v2043_v59 = vmul.f32 0.70710677, %v2030_v56  ;;  %v2032_v62 = vpop.f32.mrb[29].mxu0  ;;  %v1790_v45 = vmul.f32 %v3781_v37, %v4545_v61  ;;  %v1801_v37 = vand.u32 2147483648, %v1778_v63 }
 0x40c   : > { %v3785_v51 = vpop.eup %3784  ;;  %v2044_v7 = vmul.f32 0.70710677, %v2032_v62  ;;  %v2034_v2 = vpop.f32.mrb[30].mxu0  ;;  %v1797_v10 = vmul.f32 %v3783_v58, %v1778_v63  ;;  %v1785_v42 = vsel %vm1784_vm12, %v1776_v54, %v1783_v55  ;;  %v1808_v58 = vand.u32 2147483648, %v1779_v5 }
 0x40d   : > { %3790 = verf.f32 %v2043_v59  ;;  %v2045_v3 = vmul.f32 0.70710677, %v2034_v2  ;;  %v2036_v6 = vpop.f32.mrb[31].mxu0  ;;  %v1792_v0 = vsel %vm1791_vm14, %v4545_v61, %v1790_v45  ;;  %v1804_v53 = vmul.f32 %v3785_v51, %v1779_v5 }
 0x40e   : > { %3792 = verf.f32 %v2044_v7  ;;  %v2046_v11 = vmul.f32 0.70710677, %v2036_v6  ;;  %v1799_v52 = vsel %vm1798_vm15, %v1778_v63, %v1797_v10  ;;  %v1788_v59 = vsel %vm1786_vm13, %v1787_v8, %v1785_v42 }
 0x40f   : > { %3794 = verf.f32 %v2045_v3  ;;  %v1802_v50 = vsel %vm1800_vm10, %v1801_v37, %v1799_v52  ;;  %v1806_v55 = vsel %vm1805_vm11, %v1779_v5, %v1804_v53  ;;  %vm1807_vm12 = vcmp.eq.f32.partialorder %v1779_v5, 0.0 }
 0x410   : > { %3796 = verf.f32 %v2046_v11  ;;  %v1824_v7 = vpack.c.bf16 %v1802_v50, %v1788_v59  ;;  %v1795_v3 = vsel %vm1793_vm9, %v1794_v4, %v1792_v0  ;;  %v1809_v34 = vsel %vm1807_vm12, %v1808_v58, %v1806_v55 }
 0x411   : > { %v3787_v49 = vpop.eup %3786  ;;  %v1825_v24 = vpack.c.bf16 %v1809_v34, %v1795_v3  ;;  %vm1812_vm14 = vcmp.eq.f32.partialorder %v1780_v9, inf  ;;  %v1815_v63 = vand.u32 2147483648, %v1780_v9  ;;  %vm1819_vm15 = vcmp.eq.f32.partialorder %v1781_v44, inf }
 0x412   : > { %v3789_v48 = vpop.eup %3788  ;;  %v1811_v25 = vmul.f32 %v3787_v49, %v1780_v9  ;;  %v1822_v51 = vand.u32 2147483648, %v1781_v44  ;;  %vm1814_vm13 = vcmp.eq.f32.partialorder %v1780_v9, 0.0  ;;  %vm1821_vm10 = vcmp.eq.f32.partialorder %v1781_v44, 0.0 }
 0x413   : > { %v1818_v45 = vmul.f32 %v3789_v48, %v1781_v44  ;;  %1872 = vmatprep.subr.bf16.mxu1 %v1825_v24  ;;  %v2039_v4 = vmul.f32 0.5, %v2030_v56  ;;  %v2040_v10 = vmul.f32 0.5, %v2032_v62  ;;  %v2042_v37 = vmul.f32 0.5, %v2036_v6 }
 0x414   : > { %v1813_v54 = vsel %vm1812_vm14, %v1780_v9, %v1811_v25  ;;  %1873 = vmatpush1.bf16.msra.mxu1 %v1824_v7  ;;  %v2041_v9 = vmul.f32 0.5, %v2034_v2  ;;  %vm5047_vm14 = vcmp.lt.s32.totalorder %v4014_v60, 113 }
 0x415   : > { %v1820_v52 = vsel %vm1819_vm15, %v1781_v44, %v1818_v45  ;;  %v1816_v61 = vsel %vm1814_vm13, %v1815_v63, %v1813_v54  ;;  %vm5048_vm15 = vmmov %vm5047_vm14 }
 0x416   : > { %v1823_v53 = vsel %vm1821_vm10, %v1822_v51, %v1820_v52  ;;  %v1826_v5 = vpack.c.bf16 %v1816_v61, %v1816_v61  ;;  %vm5049_vm13 = vmmov %vm5047_vm14 }
 0x417   : > { %v3791_v50 = vpop.eup %3790  ;;  %v1827_v8 = vpack.c.bf16 %v1823_v53, %v1823_v53  ;;  %vm5050_vm10 = vmmov %vm5049_vm13 }
 0x418   : > { %v3793_v0 = vpop.eup %3792  ;;  %v2051_v49 = vadd.f32 1.0, %v3791_v50  ;;  %v1867_v34 = vsel %vm401_vm0, %v1826_v5, 0 }
 0x419   : > { %v3795_v48 = vpop.eup %3794  ;;  %v2052_v42 = vadd.f32 1.0, %v3793_v0  ;;  %3255 = vmatprep.subr.msk.bf16.mxu1 %vm401_vm0, %v1827_v8 }
 0x41a   : > { %v3797_v25 = vpop.eup %3796  ;;  %v4560_v24 = vmul.f32 %v2051_v49, %v2039_v4  ;;  %v2053_v44 = vadd.f32 1.0, %v3795_v48  ;;  %1875 = vmatpush1.bf16.msra.mxu1 %v1867_v34 }
 0x41b   : > { %v4562_v11 = vmul.f32 %v2052_v42, %v2040_v10  ;;  %v2054_v58 = vadd.f32 1.0, %v3797_v25  ;;  %2770 = vmatprep.subr.bf16.mxu1 %v4082_v1 }
 0x41c   : > { %v4565_v56 = vmul.f32 %v2053_v44, %v2041_v9  ;;  %v2059_v62 = vmul.f32 %v4560_v24, %v3961_v31  ;;  %v2063_v2 = vmul.f32 %v4560_v24, %v3957_v26 }
 0x41d   : > { %v4569_v59 = vmul.f32 %v2054_v58, %v2042_v37  ;;  %v2060_v55 = vmul.f32 %v4562_v11, %v3963_v32  ;;  %v2064_v7 = vmul.f32 %v4562_v11, %v3959_v27 }
 0x41e   : > { %v3548_v6 = vpack.i.bf16 %v4565_v56, %v4560_v24  ;;  %v2061_v1 = vmul.f32 %v4565_v56, %v3961_v31  ;;  %v2065_v3 = vmul.f32 %v4565_v56, %v3957_v26  ;;  %v2363_v53 = vpack.c.bf16 %v4565_v56, %v4560_v24 }
 0x41f   : > { %v3553_v45 = vpack.i.bf16 %v4569_v59, %v4562_v11  ;;  %v2062_v63 = vmul.f32 %v4569_v59, %v3963_v32  ;;  %v2066_v51 = vmul.f32 %v4569_v59, %v3959_v27  ;;  %v2364_v26 = vpack.c.bf16 %v4569_v59, %v4562_v11  ;;  %v3843_v11 = vld [vmem:[%s5012_s2 + $0x20] ss:$0 sps:$4 sm:$0xff]  }
 0x420   : > { %3549 = vrot.lane.b32.xlu0 %v3548_v6, %s3885_s16  ;;  %v3558_v54 = vpack.i.bf16 %v2061_v1, %v2059_v62  ;;  %v3568_v52 = vpack.i.bf16 %v2065_v3, %v2063_v2 }
 0x421   : > { %3554 = vrot.lane.b32.xlu1 %v3553_v45, %s3885_s16  ;;  %v3563_v61 = vpack.i.bf16 %v2062_v63, %v2060_v55  ;;  %v3573_v31 = vpack.i.bf16 %v2066_v51, %v2064_v7 }
 0x424   : > { %3559 = vrot.lane.b32.xlu0 %v3558_v54, %s3880_s11 }
 0x425   : > { %3564 = vrot.lane.b32.xlu1 %v3563_v61, %s3880_s11 }
 0x428   : > { %3569 = vrot.lane.b32.xlu0 %v3568_v52, %s3879_s10 }
 0x429   : > { %3574 = vrot.lane.b32.xlu1 %v3573_v31, %s3879_s10 }
 0x42c   : > { %3579 = vrot.lane.b32.xlu0 %v3558_v54, %s3881_s12 }
 0x42d   : > { %3584 = vrot.lane.b32.xlu1 %v3563_v61, %s3881_s12 }
 0x430   : > { %3589 = vrot.lane.b32.xlu0 %v3568_v52, %s3882_s13 }
 0x431   : > { %3594 = vrot.lane.b32.xlu1 %v3573_v31, %s3882_s13 }
 0x434   : > { %3599 = vrot.lane.b32.xlu0 %v3558_v54, %s3883_s14 }
 0x435   : > { %3604 = vrot.lane.b32.xlu1 %v3563_v61, %s3883_s14 }
 0x438   : > { %3609 = vrot.lane.b32.xlu0 %v3548_v6, %s3884_s15 }
 0x439   : > { %3614 = vrot.lane.b32.xlu1 %v3553_v45, %s3884_s15 }
 0x43c   : > { %3619 = vrot.lane.b32.xlu0 %v3568_v52, %s3886_s17 }
 0x43d   : > { %3624 = vrot.lane.b32.xlu1 %v3573_v31, %s3886_s17 }
 0x492   : > { %v3550_v27 = vpop.permute.xlu0 %3549 }
 0x493   : > { %v3552_v32 = vunpack.i.h.bf16 %v3550_v27  ;;  %v3551_v5 = vunpack.i.l.bf16 %v3550_v27  ;;  %v3555_v50 = vpop.permute.xlu1 %3554  ;;  %v3823_v27 = vld [vmem:[%s5012_s2 + $0xc] sm:$0xff]  }
 0x494   : > { %v3557_v8 = vunpack.i.h.bf16 %v3555_v50  ;;  %v3556_v0 = vunpack.i.l.bf16 %v3555_v50 }
 0x496   : > { %v2090_v4 = vsel %vm526_vm7, %v3552_v32, %v3557_v8  ;;  %v2092_v49 = vsel %vm526_vm7, %v3557_v8, %v3552_v32  ;;  %v2089_v34 = vsel %vm526_vm7, %v3551_v5, %v3556_v0  ;;  %v2091_v48 = vsel %vm526_vm7, %v3556_v0, %v3551_v5  ;;  %v3560_v10 = vpop.permute.xlu0 %3559 }
 0x497   : > { %v2094_v42 = vpack.c.bf16 %v2090_v4, %v2089_v34  ;;  %v3562_v25 = vunpack.i.h.bf16 %v3560_v10  ;;  %v3561_v9 = vunpack.i.l.bf16 %v3560_v10  ;;  %v3565_v44 = vpop.permute.xlu1 %3564  ;;  %v2093_v37 = vpack.c.bf16 %v2092_v49, %v2091_v48  ;;  %v3824_v10 = vld [vmem:[%s5012_s2 + $0x14] ss:$0 sps:$4 sm:$0xff]  }
 0x498   : > { %v3567_v58 = vunpack.i.h.bf16 %v3565_v44  ;;  %v3566_v62 = vunpack.i.l.bf16 %v3565_v44  ;;  %v5038_v0 = vmov 0  }
 0x499   : > { %3270 = vmatprep.subr.msk.bf16.mxu0 %vm548_vm4, %v2094_v42  ;;  %v2096_v55 = vsel %vm548_vm4, %v2093_v37, 0  ;;  %v4650_v42 = vld [vmem:[%s5015_s5] sm:$0xff]  }
 0x49a   : > { %v2076_v2 = vsel %vm511_vm2, %v3562_v25, %v3567_v58  ;;  %v2078_v7 = vsel %vm511_vm2, %v3567_v58, %v3562_v25  ;;  %v2075_v6 = vsel %vm511_vm2, %v3561_v9, %v3566_v62  ;;  %v2077_v1 = vsel %vm511_vm2, %v3566_v62, %v3561_v9  ;;  %v3570_v3 = vpop.permute.xlu0 %3569  ;;  %2102 = vmatpush1.bf16.msra.mxu0 %v2096_v55  ;;  %v3825_v58 = vld [vmem:[%s5014_s4] ss:$16 sps:$4 sm:$0xff]   ;;  %v3826_v55 = vld [vmem:[%s5014_s4 + $0x24] ss:$16 sps:$4 sm:$0xff]  }
 0x49b   : > { %v2080_v45 = vpack.c.bf16 %v2076_v2, %v2075_v6  ;;  %v3572_v63 = vunpack.i.h.bf16 %v3570_v3  ;;  %v3571_v51 = vunpack.i.l.bf16 %v3570_v3  ;;  %v3575_v54 = vpop.permute.xlu1 %3574  ;;  %v2079_v52 = vpack.c.bf16 %v2078_v7, %v2077_v1  ;;  %3256 = vmatmul.mubr.msk.bf16.vlgmr.msra.gmra.mrb[8].mxu1 %vm397_vm1, %v4650_v42  ;;  %v3827_v6 = vld [vmem:[%s5014_s4 + $0x20] ss:$16 sps:$4 sm:$0xff]  }
 0x49c   : > { %v3577_v61 = vunpack.i.h.bf16 %v3575_v54  ;;  %v3576_v31 = vunpack.i.l.bf16 %v3575_v54  ;;  %2771 = vmatpush1.bf16.msra.mxu1 %v3825_v58  ;;  %1914 = vmatprep.mubr.bf16.mxu1 %v5038_v0  ;;  %v3828_v3 = vld [vmem:[%s5012_s2] sm:$0xff]   ;;  %vm5039_vm2 = vcmp.lt.s32.totalorder %v4014_v60, 115 }
 0x49d   : > { %3271 = vmatmul.mubr.msk.bf16.vlgmr.msra.gmra.mrb[32].mxu0 %vm541_vm6, %v3823_v27  ;;  %3273 = vmatprep.subr.msk.bf16.mxu0 %vm548_vm4, %v2080_v45  ;;  %v2153_v32 = vsel %vm548_vm4, %v2079_v52, 0  ;;  %v3830_v54 = vld [vmem:[%s5014_s4 + $0x40] ss:$16 sps:$4 sm:$0xff]   ;;  %v3831_v52 = vld [vmem:[%s5014_s4 + $0x64] ss:$16 sps:$4 sm:$0xff]   ;;  %vm5042_vm7 = vmmov %vm5039_vm2 }
 0x49e   : > { %v2218_v5 = vsel %vm685_vm3, %v3572_v63, %v3577_v61  ;;  %v2217_v50 = vsel %vm685_vm3, %v3571_v51, %v3576_v31  ;;  %2159 = vmatpush1.bf16.msra.mxu0 %v2153_v32  ;;  %2143 = vmatprep.mubr.bf16.mxu0 %v5038_v0  ;;  %v3580_v4 = vpop.permute.xlu0 %3579  ;;  %v2220_v34 = vsel %vm685_vm3, %v3577_v61, %v3572_v63  ;;  %v3829_v63 = vld [vmem:[%s5014_s4 + $0x44] ss:$16 sps:$4 sm:$0xff]   ;;  %v3832_v61 = vld [vmem:[%s5014_s4 + $0x60] ss:$16 sps:$4 sm:$0xff]  }
 0x49f   : > { %v2222_v8 = vpack.c.bf16 %v2218_v5, %v2217_v50  ;;  %v3585_v49 = vpop.permute.xlu1 %3584  ;;  %v2219_v48 = vsel %vm685_vm3, %v3576_v31, %v3571_v51  ;;  %v3582_v25 = vunpack.i.h.bf16 %v3580_v4  ;;  %v3581_v9 = vunpack.i.l.bf16 %v3580_v4  ;;  %2772 = vmatprep.subr.bf16.mxu1 %v3826_v55  ;;  %v4680_v51 = vld [vmem:[%s5015_s5 + $0x8] sm:$0xff]   ;;  %v3834_v27 = vld [vmem:[%s5014_s4 + $0x84] ss:$16 sps:$4 sm:$0xff]   ;;  %vm5040_vm3 = vmmov %vm5039_vm2 }
 0x4a0   : > { %v3587_v44 = vunpack.i.h.bf16 %v3585_v49  ;;  %v3586_v37 = vunpack.i.l.bf16 %v3585_v49  ;;  %v2221_v62 = vpack.c.bf16 %v2220_v34, %v2219_v48  ;;  %2773 = vmatpush1.bf16.msra.mxu1 %v3827_v6  ;;  %v3833_v31 = vld [vmem:[%s5012_s2 + $0x8] ss:$0 sps:$4 sm:$0xff]   ;;  %v4706_v32 = vld [vmem:[%s5015_s5 + $0x10] sm:$0xff]   ;;  %v3838_v48 = vld [vmem:[%s5012_s2 + $0x18] sm:$0xff]  }
 0x4a1   : > { %3276 = vmatprep.subr.msk.bf16.mxu0 %vm548_vm4, %v2222_v8  ;;  %2774 = vmatprep.subr.bf16.mxu1 %v3829_v63  ;;  %v3835_v8 = vld [vmem:[%s5014_s4 + $0x80] ss:$16 sps:$4 sm:$0xff]   ;;  %v3836_v49 = vld [vmem:[%s5014_s4 + $0xa4] ss:$16 sps:$4 sm:$0xff]  }
 0x4a2   : > { %v2295_v2 = vsel %vm777_vm5, %v3582_v25, %v3587_v44  ;;  %v2294_v7 = vsel %vm777_vm5, %v3581_v9, %v3586_v37  ;;  %v2224_v45 = vsel %vm548_vm4, %v2221_v62, 0  ;;  %v2297_v5 = vsel %vm777_vm5, %v3587_v44, %v3582_v25  ;;  %v3837_v34 = vld [vmem:[%s5014_s4 + $0xa0] ss:$16 sps:$4 sm:$0xff]   ;;  %v3839_v25 = vld [vmem:[%s5014_s4 + $0xc4] ss:$16 sps:$4 sm:$0xff]  }
 0x4a3   : > { %v2299_v1 = vpack.c.bf16 %v2295_v2, %v2294_v7  ;;  %3257 = vmatmul.mubr.msk.bf16.gmra.mrb[12].mxu1 %vm397_vm1, %v4680_v51  ;;  %v2296_v50 = vsel %vm777_vm5, %v3586_v37, %v3581_v9  ;;  %v3840_v9 = vld [vmem:[%s5014_s4 + $0xc0] ss:$16 sps:$4 sm:$0xff]   ;;  %v3841_v44 = vld [vmem:[%s5014_s4 + $0xe4] ss:$16 sps:$4 sm:$0xff]   ;;  %v3590_v37 = vpop.permute.xlu0 %3589  ;;  %v3595_v58 = vpop.permute.xlu1 %3594  ;;  %vm5041_vm5 = vmmov %vm5039_vm2 }
 0x4a4   : > { %2775 = vmatpush1.bf16.msra.mxu1 %v3830_v54  ;;  %1924 = vmatprep.mubr.bf16.mxu1 %v5038_v0  ;;  %v2298_v4 = vpack.c.bf16 %v2297_v5, %v2296_v50  ;;  %v3842_v62 = vld [vmem:[%s5014_s4 + $0xe0] ss:$16 sps:$4 sm:$0xff]   ;;  %v3592_v59 = vunpack.i.h.bf16 %v3590_v37  ;;  %v3597_v55 = vunpack.i.h.bf16 %v3595_v58  ;;  %v3596_v2 = vunpack.i.l.bf16 %v3595_v58 }
 0x4a5   : > { %3272 = vmatmul.mubr.msk.bf16.gmra.mrb[36].mxu0 %vm541_vm6, %v3824_v10  ;;  %2776 = vmatprep.subr.bf16.mxu1 %v3831_v52  ;;  %v3844_v7 = vld [vmem:[%s5014_s4 + $0x100] ss:$16 sps:$4 sm:$0xff]  }
 0x4a6   : > { %2190 = vmatprep.mubr.bf16.mxu0 %v5038_v0  ;;  %v2301_v10 = vsel %vm548_vm4, %v2298_v4, 0  ;;  %v2439_v6 = vsel %vm948_vm8, %v3597_v55, %v3592_v59  ;;  %v2437_v24 = vsel %vm948_vm8, %v3592_v59, %v3597_v55 }
 0x4a8   : > { %2777 = vmatpush1.bf16.msra.mxu1 %v3832_v61  ;;  %v3847_v61 = vld [vmem:[%s5012_s2 + $0x30] sm:$0xff]  }
 0x4a9   : > { %2778 = vmatprep.subr.bf16.mxu1 %v3834_v27 }
 0x4ab   : > { %3258 = vmatmul.mubr.msk.bf16.gmra.mrb[16].mxu1 %vm397_vm1, %v4706_v32 }
 0x4ac   : > { %2779 = vmatpush1.bf16.msra.mxu1 %v3835_v8  ;;  %1934 = vmatprep.mubr.bf16.mxu1 %v5038_v0 }
 0x4ad   : > { %3274 = vmatmul.mubr.msk.bf16.vlgmr.msra.gmra.mrb[32].mxu0 %vm541_vm6, %v3828_v3  ;;  %2780 = vmatprep.subr.bf16.mxu1 %v3836_v49  ;;  %v3845_v3 = vld [vmem:[%s5012_s2 + $0x24] sm:$0xff]  }
 0x4ae   : > { %2230 = vmatpush1.bf16.msra.mxu0 %v2224_v45  ;;  %2200 = vmatprep.mubr.bf16.mxu0 %v5038_v0  ;;  %v3605_v45 = vpop.permute.xlu1 %3604 }
 0x4af   : > { %3279 = vmatprep.subr.msk.bf16.mxu0 %vm548_vm4, %v2299_v1  ;;  %v3606_v63 = vunpack.i.l.bf16 %v3605_v45 }
 0x4b0   : > { %2781 = vmatpush1.bf16.msra.mxu1 %v3837_v34  ;;  %v3849_v34 = vld [vmem:[%s5012_s2 + $0x3c] sm:$0xff]  }
 0x4b1   : > { %2782 = vmatprep.subr.bf16.mxu1 %v3839_v25 }
 0x4b4   : > { %2783 = vmatpush1.bf16.msra.mxu1 %v3840_v9 }
 0x4b5   : > { %3275 = vmatmul.mubr.msk.bf16.gmra.mrb[36].mxu0 %vm541_vm6, %v3833_v31  ;;  %2784 = vmatprep.subr.bf16.mxu1 %v3841_v44  ;;  %v3850_v44 = vld [vmem:[%s5012_s2 + $0x44] ss:$0 sps:$4 sm:$0xff]  }
 0x4b6   : > { %2261 = vmatprep.mubr.bf16.mxu0 %v5038_v0 }
 0x4b8   : > { %2785 = vmatpush1.bf16.msra.mxu1 %v3842_v62 }
 0x4b9   : > { %2786 = vmatprep.subr.bf16.mxu1 %v4195_v38 }
 0x4bc   : > { %2787 = vmatpush1.bf16.msra.mxu1 %v3844_v7  ;;  %v3851_v7 = vld [vmem:[%s5012_s2 + $0x48] sm:$0xff]  }
 0x4bd   : > { %3277 = vmatmul.mubr.msk.bf16.vlgmr.msra.gmra.mrb[32].mxu0 %vm541_vm6, %v3838_v48  ;;  %2788 = vmatprep.subr.bf16.mxu1 %v4278_v23  ;;  %v2366_v23 = vsel %vm548_vm4, %v2363_v53, 0  ;;  %v3607_v53 = vunpack.i.h.bf16 %v3605_v45 }
 0x4be   : > { %2307 = vmatpush1.bf16.msra.mxu0 %v2301_v10  ;;  %2271 = vmatprep.mubr.bf16.mxu0 %v5038_v0 }
 0x4bf   : > { %3282 = vmatprep.subr.msk.bf16.mxu0 %vm548_vm4, %v2364_v26  ;;  %v3591_v26 = vunpack.i.l.bf16 %v3590_v37 }
 0x4c0   : > { %2789 = vmatpush1.bf16.msra.mxu1 %v4273_v22  ;;  %v3600_v22 = vpop.permute.xlu0 %3599 }
 0x4c1   : > { %v2438_v1 = vsel %vm948_vm8, %v3596_v2, %v3591_v26  ;;  %2790 = vmatprep.subr.bf16.mxu1 %v4300_v40  ;;  %v2436_v56 = vsel %vm948_vm8, %v3591_v26, %v3596_v2  ;;  %v3846_v40 = vld [vmem:[%s5012_s2 + $0x2c] ss:$0 sps:$4 sm:$0xff]   ;;  %vm5043_vm8 = vcmp.lt.s32.totalorder %v4014_v60, 114  ;;  %v3854_v60 = vld [vmem:[%s5012_s2 + $0x5c] ss:$0 sps:$4 sm:$0xff]  }
 0x4c2   : > { %v2441_v38 = vpack.c.bf16 %v2439_v6, %v2438_v1  ;;  %vm5044_vm9 = vmmov %vm5043_vm8  ;;  %v3852_v1 = vld [vmem:[%s5012_s2 + $0x50] ss:$0 sps:$4 sm:$0xff]  }
 0x4c3   : > { %vm5045_vm11 = vmmov %vm5043_vm8 }
 0x4c4   : > { %2791 = vmatpush1.bf16.msra.mxu1 %v4305_v57  ;;  %v3602_v57 = vunpack.i.h.bf16 %v3600_v22  ;;  %vm5046_vm12 = vmmov %vm5043_vm8 }
 0x4c5   : > { %3278 = vmatmul.mubr.msk.bf16.gmra.mrb[36].mxu0 %vm541_vm6, %v3843_v11  ;;  %2792 = vmatprep.subr.bf16.mxu1 %v4312_v28  ;;  %v3601_v28 = vunpack.i.l.bf16 %v3600_v22  ;;  %v3853_v22 = vld [vmem:[%s5012_s2 + $0x54] sm:$0xff]  }
 0x4c6   : > { %2338 = vmatprep.mubr.bf16.mxu0 %v5038_v0  ;;  %v2516_v54 = vsel %vm5039_vm2, %v3607_v53, %v3602_v57  ;;  %v2514_v31 = vsel %vm5041_vm5, %v3602_v57, %v3607_v53  ;;  %v4885_v57 = vld [vmem:[%s5015_s5 + $0x20] ss:$0 sps:$4 sm:$0xff]  }
 0x4c7   : > { %v2515_v52 = vsel %vm5040_vm3, %v3606_v63, %v3601_v28  ;;  %v2513_v27 = vsel %vm5042_vm7, %v3601_v28, %v3606_v63 }
 0x4c8   : > { %2793 = vmatpush1.bf16.msra.mxu1 %v4317_v29  ;;  %v2440_v29 = vpack.c.bf16 %v2437_v24, %v2436_v56  ;;  %v3855_v24 = vld [vmem:[%s5012_s2 + $0x60] sm:$0xff]   ;;  %v3856_v56 = vld [vmem:[%s5012_s2 + $0x68] ss:$0 sps:$4 sm:$0xff]  }
 0x4c9   : > { %2794 = vmatprep.subr.bf16.mxu1 %v4324_v30  ;;  %v2518_v30 = vpack.c.bf16 %v2516_v54, %v2515_v52 }
 0x4cc   : > { %2795 = vmatpush1.bf16.msra.mxu1 %v4329_v33  ;;  %v2443_v33 = vsel %vm548_vm4, %v2440_v29, 0 }
 0x4cd   : > { %3280 = vmatmul.mubr.msk.bf16.vlgmr.msra.gmra.mrb[32].mxu0 %vm541_vm6, %v3845_v3  ;;  %2796 = vmatprep.subr.bf16.mxu1 %v4336_v35  ;;  %v3610_v35 = vpop.permute.xlu0 %3609 }
 0x4ce   : > { %2372 = vmatpush1.bf16.msra.mxu0 %v2366_v23  ;;  %2348 = vmatprep.mubr.bf16.mxu0 %v5038_v0 }
 0x4cf   : > { %3285 = vmatprep.subr.msk.bf16.mxu0 %vm548_vm4, %v2441_v38 }
 0x4d0   : > { %2797 = vmatpush1.bf16.msra.mxu1 %v4341_v36  ;;  %v3615_v36 = vpop.permute.xlu1 %3614 }
 0x4d1   : > { %2798 = vmatprep.subr.bf16.mxu1 %v4348_v41  ;;  %v3848_v41 = vld [vmem:[%s5012_s2 + $0x38] ss:$0 sps:$4 sm:$0xff]   ;;  %v3617_v5 = vunpack.i.h.bf16 %v3615_v36  ;;  %v3616_v50 = vunpack.i.l.bf16 %v3615_v36  ;;  %v3620_v48 = vpop.permute.xlu0 %3619 }
 0x4d2   : > { %v3622_v37 = vunpack.i.h.bf16 %v3620_v48  ;;  %v3621_v58 = vunpack.i.l.bf16 %v3620_v48 }
 0x4d4   : > { %2799 = vmatpush1.bf16.msra.mxu1 %v4353_v43  ;;  %v3612_v43 = vunpack.i.h.bf16 %v3610_v35  ;;  %v3625_v10 = vpop.permute.xlu1 %3624 }
 0x4d5   : > { %3281 = vmatmul.mubr.msk.bf16.gmra.mrb[36].mxu0 %vm541_vm6, %v3846_v40  ;;  %2800 = vmatprep.subr.bf16.mxu1 %v4360_v46  ;;  %v3611_v46 = vunpack.i.l.bf16 %v3610_v35  ;;  %v3627_v62 = vunpack.i.h.bf16 %v3625_v10  ;;  %v3626_v11 = vunpack.i.l.bf16 %v3625_v10  ;;  %v4877_v40 = vld [vmem:[%s5015_s5 + $0x18] sm:$0xff]  }
 0x4d6   : > { %2403 = vmatprep.mubr.bf16.mxu0 %v5038_v0  ;;  %v2593_v8 = vsel %vm5043_vm8, %v3617_v5, %v3612_v43  ;;  %v2591_v25 = vsel %vm5045_vm11, %v3612_v43, %v3617_v5  ;;  %3259 = vmatmul.mubr.msk.bf16.gmra.mrb[20].mxu1 %vm397_vm1, %v4877_v40 }
 0x4d7   : > { %v2592_v4 = vsel %vm5044_vm9, %v3616_v50, %v3611_v46  ;;  %v2590_v9 = vsel %vm5046_vm12, %v3611_v46, %v3616_v50  ;;  %v2670_v26 = vsel %vm5047_vm14, %v3627_v62, %v3622_v37  ;;  %v2669_v55 = vsel %vm5048_vm15, %v3626_v11, %v3621_v58  ;;  %1944 = vmatprep.mubr.bf16.mxu1 %v5038_v0 }
 0x4d8   : > { %2801 = vmatpush1.bf16.msra.mxu1 %v4365_v47  ;;  %v2517_v47 = vpack.c.bf16 %v2514_v31, %v2513_v27  ;;  %v2595_v49 = vpack.c.bf16 %v2593_v8, %v2592_v4  ;;  %v2594_v59 = vpack.c.bf16 %v2591_v25, %v2590_v9  ;;  %v2672_v2 = vpack.c.bf16 %v2670_v26, %v2669_v55 }
 0x4d9   : > { %2821 = vmatprep.subr.bf16.mxu1 %v4372_v39  ;;  %v2668_v38 = vsel %vm5049_vm13, %v3622_v37, %v3627_v62  ;;  %v2667_v3 = vsel %vm5050_vm10, %v3621_v58, %v3626_v11 }
 0x4da   : > { %v2520_v39 = vsel %vm548_vm4, %v2517_v47, 0  ;;  %v2597_v6 = vsel %vm548_vm4, %v2594_v59, 0  ;;  %v2671_v23 = vpack.c.bf16 %v2668_v38, %v2667_v3 }
 0x4dc   : > { %v2674_v45 = vsel %vm548_vm4, %v2671_v23, 0 }
 0x4dd   : > { %3283 = vmatmul.mubr.msk.bf16.vlgmr.msra.gmra.mrb[32].mxu0 %vm541_vm6, %v3847_v61 }
 0x4de   : > { %2449 = vmatpush1.bf16.msra.mxu0 %v2443_v33  ;;  %2413 = vmatprep.mubr.bf16.mxu0 %v5038_v0 }
 0x4df   : > { %3288 = vmatprep.subr.msk.bf16.mxu0 %vm548_vm4, %v2518_v30  ;;  %3260 = vmatmul.mubr.msk.bf16.gmra.mrb[24].mxu1 %vm397_vm1, %v4885_v57 }
 0x4e5   : > { %3284 = vmatmul.mubr.msk.bf16.gmra.mrb[36].mxu0 %vm541_vm6, %v3848_v41 }
 0x4e6   : > { %2480 = vmatprep.mubr.bf16.mxu0 %v5038_v0 }
 0x4ed   : > { %3286 = vmatmul.mubr.msk.bf16.vlgmr.msra.gmra.mrb[32].mxu0 %vm541_vm6, %v3849_v34 }
 0x4ee   : > { %2526 = vmatpush1.bf16.msra.mxu0 %v2520_v39  ;;  %2490 = vmatprep.mubr.bf16.mxu0 %v5038_v0 }
 0x4ef   : > { %3291 = vmatprep.subr.msk.bf16.mxu0 %vm548_vm4, %v2595_v49 }
 0x4f5   : > { %3287 = vmatmul.mubr.msk.bf16.gmra.mrb[36].mxu0 %vm541_vm6, %v3850_v44 }
 0x4f6   : > { %2557 = vmatprep.mubr.bf16.mxu0 %v5038_v0 }
 0x4fd   : > { %3289 = vmatmul.mubr.msk.bf16.vlgmr.msra.gmra.mrb[32].mxu0 %vm541_vm6, %v3851_v7 }
 0x4fe   : > { %2603 = vmatpush1.bf16.msra.mxu0 %v2597_v6  ;;  %2567 = vmatprep.mubr.bf16.mxu0 %v5038_v0 }
 0x4ff   : > { %3294 = vmatprep.subr.msk.bf16.mxu0 %vm548_vm4, %v2672_v2 }
 0x505   : > { %3290 = vmatmul.mubr.msk.bf16.gmra.mrb[36].mxu0 %vm541_vm6, %v3852_v1 }
 0x506   : > { %2634 = vmatprep.mubr.bf16.mxu0 %v5038_v0 }
 0x50d   : > { %3292 = vmatmul.mubr.msk.bf16.vlgmr.msra.gmra.mrb[32].mxu0 %vm541_vm6, %v3853_v22 }
 0x50e   : > { %2680 = vmatpush1.bf16.msra.mxu0 %v2674_v45  ;;  %2644 = vmatprep.mubr.bf16.mxu0 %v5038_v0 }
 0x515   : > { %3293 = vmatmul.mubr.msk.bf16.gmra.mrb[36].mxu0 %vm541_vm6, %v3854_v60 }
 0x516   : > { %2711 = vmatprep.mubr.bf16.mxu0 %v5038_v0 }
 0x51d   : > { %3295 = vmatmul.mubr.msk.bf16.vlgmr.msra.gmra.mrb[32].mxu0 %vm541_vm6, %v3855_v24 }
 0x51e   : > { %2721 = vmatprep.mubr.bf16.mxu0 %v5038_v0 }
 0x525   : > { %3296 = vmatmul.mubr.msk.bf16.gmra.mrb[36].mxu0 %vm541_vm6, %v3856_v56 }
 0x56e   : > { %v1906_v28 = vpop.f32.mrb[8].mxu1 }
 0x56f   : > { %1953 = vst [vmem:[%s4893_s22] sm:$0xff] %v1906_v28  ;;  %v1908_v53 = vpop.f32.mrb[9].mxu1 }
 0x570   : > { %1954 = vst [vmem:[%s4893_s22 + $0x8] sm:$0xff] %v1908_v53  ;;  %v1910_v63 = vpop.f32.mrb[10].mxu1 }
 0x571   : > { %1955 = vst [vmem:[%s4893_s22 + $0x10] sm:$0xff] %v1910_v63  ;;  %v1912_v29 = vpop.f32.mrb[11].mxu1 }
 0x572   : > { %1956 = vst [vmem:[%s4893_s22 + $0x18] sm:$0xff] %v1912_v29  ;;  %v3857_v29 = vld [vmem:[%s5014_s4 + $0x8] ss:$16 sps:$4 sm:$0xff]  }
 0x576   : > { %v1916_v54 = vpop.f32.mrb[12].mxu1 }
 0x577   : > { %1957 = vst [vmem:[%s4893_s22 + $0x20] sm:$0xff] %v1916_v54  ;;  %v1918_v52 = vpop.f32.mrb[13].mxu1 }
 0x578   : > { %1958 = vst [vmem:[%s4893_s22 + $0x28] sm:$0xff] %v1918_v52  ;;  %v1920_v30 = vpop.f32.mrb[14].mxu1  ;;  %v3858_v52 = vld [vmem:[%s5014_s4 + $0x2c] ss:$16 sps:$4 sm:$0xff]  }
 0x579   : > { %1959 = vst [vmem:[%s4893_s22 + $0x30] sm:$0xff] %v1920_v30  ;;  %v1922_v61 = vpop.f32.mrb[15].mxu1 }
 0x57a   : > { %1960 = vst [vmem:[%s4893_s22 + $0x38] sm:$0xff] %v1922_v61  ;;  %v3859_v61 = vld [vmem:[%s5014_s4 + $0x28] ss:$16 sps:$4 sm:$0xff]  }
 0x57e   : > { %v1926_v33 = vpop.f32.mrb[16].mxu1 }
 0x57f   : > { %1961 = vst [vmem:[%s4893_s22 + $0x40] sm:$0xff] %v1926_v33  ;;  %v1928_v35 = vpop.f32.mrb[17].mxu1  ;;  %v3860_v33 = vld [vmem:[%s5014_s4 + $0x4c] ss:$16 sps:$4 sm:$0xff]  }
 0x580   : > { %1962 = vst [vmem:[%s4893_s22 + $0x48] sm:$0xff] %v1928_v35  ;;  %v1930_v36 = vpop.f32.mrb[18].mxu1 }
 0x581   : > { %1963 = vst [vmem:[%s4893_s22 + $0x50] sm:$0xff] %v1930_v36  ;;  %v1932_v31 = vpop.f32.mrb[19].mxu1  ;;  %v3861_v36 = vld [vmem:[%s5014_s4 + $0x48] ss:$16 sps:$4 sm:$0xff]  }
 0x582   : > { %1964 = vst [vmem:[%s4893_s22 + $0x58] sm:$0xff] %v1932_v31  ;;  %v3862_v31 = vld [vmem:[%s5014_s4 + $0x6c] ss:$16 sps:$4 sm:$0xff]  }
 0x5f0   : > { %v2713_v27 = vpop.f32.mrb[32].mxu0 }
 0x5f1   : > { %v2742_v41 = vmul.f32 0.70710677, %v2713_v27  ;;  %v2715_v43 = vpop.f32.mrb[33].mxu0  ;;  %v2736_v11 = vmul.f32 0.5, %v2713_v27  ;;  %v3863_v27 = vld [vmem:[%s5014_s4 + $0x68] ss:$16 sps:$4 sm:$0xff]  }
 0x5f2   : > { %v2743_v46 = vmul.f32 0.70710677, %v2715_v43  ;;  %v2717_v5 = vpop.f32.mrb[34].mxu0  ;;  %v2737_v55 = vmul.f32 0.5, %v2715_v43  ;;  %v3865_v43 = vld [vmem:[%s5014_s4 + $0x88] ss:$16 sps:$4 sm:$0xff]  }
 0x5f3   : > { %3798 = verf.f32 %v2742_v41  ;;  %v2744_v50 = vmul.f32 0.70710677, %v2717_v5  ;;  %v2719_v47 = vpop.f32.mrb[35].mxu0  ;;  %v2738_v59 = vmul.f32 0.5, %v2717_v5  ;;  %v3864_v41 = vld [vmem:[%s5014_s4 + $0x8c] ss:$16 sps:$4 sm:$0xff]  }
 0x5f4   : > { %3800 = verf.f32 %v2743_v46  ;;  %v2745_v8 = vmul.f32 0.70710677, %v2719_v47  ;;  %v2739_v2 = vmul.f32 0.5, %v2719_v47  ;;  %v3866_v46 = vld [vmem:[%s5014_s4 + $0xac] ss:$16 sps:$4 sm:$0xff]  }
 0x5f5   : > { %3802 = verf.f32 %v2744_v50  ;;  %v3867_v5 = vld [vmem:[%s5014_s4 + $0xa8] ss:$16 sps:$4 sm:$0xff]   ;;  %v3868_v50 = vld [vmem:[%s5014_s4 + $0xcc] ss:$16 sps:$4 sm:$0xff]  }
 0x5f6   : > { %3804 = verf.f32 %v2745_v8  ;;  %v3869_v47 = vld [vmem:[%s5014_s4 + $0xc8] ss:$16 sps:$4 sm:$0xff]  }
 0x5f8   : > { %v2723_v4 = vpop.f32.mrb[36].mxu0 }
 0x5f9   : > { %v2746_v49 = vmul.f32 0.70710677, %v2723_v4  ;;  %v2725_v34 = vpop.f32.mrb[37].mxu0  ;;  %v2740_v53 = vmul.f32 0.5, %v2723_v4 }
 0x5fa   : > { %v2747_v39 = vmul.f32 0.70710677, %v2725_v34  ;;  %v2727_v48 = vpop.f32.mrb[38].mxu0  ;;  %v2741_v56 = vmul.f32 0.5, %v2725_v34 }
 0x5fb   : > { %3806 = verf.f32 %v2746_v49  ;;  %v2728_v10 = vpop.f32.mrb[39].mxu0 }
 0x5fc   : > { %3808 = verf.f32 %v2747_v39 }
 0x5fd   : > { %v3799_v25 = vpop.eup %3798 }
 0x5fe   : > { %v3801_v9 = vpop.eup %3800  ;;  %v2754_v44 = vadd.f32 1.0, %v3799_v25 }
 0x5ff   : > { %v3803_v37 = vpop.eup %3802  ;;  %v2755_v58 = vadd.f32 1.0, %v3801_v9 }
 0x600   : > { %v3805_v62 = vpop.eup %3804  ;;  %v2756_v26 = vadd.f32 1.0, %v3803_v37  ;;  %v2760_v6 = vmul.f32 %v2754_v44, %v2736_v11 }
 0x601   : > { %v2757_v7 = vadd.f32 1.0, %v3805_v62  ;;  %v2761_v38 = vmul.f32 %v2755_v58, %v2737_v55 }
 0x602   : > { %v2762_v1 = vmul.f32 %v2756_v26, %v2738_v59 }
 0x603   : > { %v2763_v3 = vmul.f32 %v2757_v7, %v2739_v2 }
 0x604   : > { %v2766_v23 = vpack.c.bf16 %v2762_v1, %v2760_v6 }
 0x605   : > { %v3807_v22 = vpop.eup %3806  ;;  %v2767_v45 = vpack.c.bf16 %v2763_v3, %v2761_v38 }
 0x606   : > { %v3809_v60 = vpop.eup %3808  ;;  %v2758_v24 = vadd.f32 1.0, %v3807_v22 }
 0x607   : > { %v2759_v28 = vadd.f32 1.0, %v3809_v60  ;;  %2802 = vmatprep.mubr.bf16.mxu1 %v2767_v45 }
 0x608   : > { %2803 = vmatmul.mubr.bf16.vlgmr.msra.gmra.mrb[28].mxu1 %v2766_v23  ;;  %v2764_v54 = vmul.f32 %v2758_v24, %v2740_v53 }
 0x609   : > { %v2765_v63 = vmul.f32 %v2759_v28, %v2741_v56  ;;  %2822 = vmatpush1.bf16.msra.mxu1 %v3857_v29 }
 0x60a   : > { %2823 = vmatprep.subr.bf16.mxu1 %v3858_v52  ;;  %v2768_v35 = vpack.c.bf16 %v2764_v54, %v2764_v54 }
 0x60b   : > { %v2769_v30 = vpack.c.bf16 %v2765_v63, %v2765_v63 }
 0x60d   : > { %2824 = vmatpush1.bf16.msra.mxu1 %v3859_v61  ;;  %2812 = vmatprep.mubr.bf16.mxu1 %v2769_v30 }
 0x60e   : > { %2825 = vmatprep.subr.bf16.mxu1 %v3860_v33 }
 0x610   : > { %2813 = vmatmul.mubr.bf16.gmra.mrb[32].mxu1 %v2768_v35 }
 0x611   : > { %2826 = vmatpush1.bf16.msra.mxu1 %v3861_v36  ;;  %2853 = vmatprep.mubr.bf16.mxu1 %v2767_v45 }
 0x612   : > { %2827 = vmatprep.subr.bf16.mxu1 %v3862_v31 }
 0x615   : > { %2828 = vmatpush1.bf16.msra.mxu1 %v3863_v27 }
 0x616   : > { %2829 = vmatprep.subr.bf16.mxu1 %v3864_v41 }
 0x619   : > { %2830 = vmatpush1.bf16.msra.mxu1 %v3865_v43 }
 0x61a   : > { %2831 = vmatprep.subr.bf16.mxu1 %v3866_v46 }
 0x61d   : > { %2832 = vmatpush1.bf16.msra.mxu1 %v3867_v5 }
 0x61e   : > { %2833 = vmatprep.subr.bf16.mxu1 %v3868_v50 }
 0x621   : > { %2834 = vmatpush1.bf16.msra.mxu1 %v3869_v47 }
 0x622   : > { %2835 = vmatprep.subr.bf16.mxu1 %v4426_v12  ;;  %v5051_v12 = vld [vmem:[#allocation2_spill] sm:$0xff] }
 0x625   : > { %2836 = vmatpush1.bf16.msra.mxu1 %v4431_v13  ;;  %v5052_v13 = vld [vmem:[#allocation3_spill] sm:$0xff] }
 0x626   : > { %2837 = vmatprep.subr.bf16.mxu1 %v4437_v14  ;;  %v5053_v14 = vld [vmem:[#allocation4_spill] sm:$0xff] }
 0x629   : > { %2838 = vmatpush1.bf16.msra.mxu1 %v4443_v15  ;;  %v5054_v15 = vld [vmem:[#allocation5_spill] sm:$0xff] }
 0x62a   : > { %2839 = vmatprep.subr.bf16.mxu1 %v4449_v16  ;;  %v5055_v16 = vld [vmem:[#allocation6_spill] sm:$0xff] }
 0x62d   : > { %2840 = vmatpush1.bf16.msra.mxu1 %v4455_v17  ;;  %v5056_v17 = vld [vmem:[#allocation7_spill] sm:$0xff] }
 0x62e   : > { %2841 = vmatprep.subr.bf16.mxu1 %v4461_v18  ;;  %v5057_v18 = vld [vmem:[#allocation8_spill] sm:$0xff] }
 0x631   : > { %2842 = vmatpush1.bf16.msra.mxu1 %v4467_v19  ;;  %v5058_v19 = vld [vmem:[#allocation9_spill] sm:$0xff] }
 0x632   : > { %2843 = vmatprep.subr.bf16.mxu1 %v4473_v20  ;;  %v1936_v20 = vpop.f32.mrb[20].mxu1 }
 0x633   : > { %1965 = vst [vmem:[%s4893_s22 + $0x60] sm:$0xff] %v1936_v20 }
 0x635   : > { %2844 = vmatpush1.bf16.msra.mxu1 %v4479_v21  ;;  %v1938_v21 = vpop.f32.mrb[21].mxu1 }
 0x636   : > { %2845 = vmatprep.subr.bf16.mxu1 %v5051_v12  ;;  %1966 = vst [vmem:[%s4893_s22 + $0x68] sm:$0xff] %v1938_v21  ;;  %v1940_v8 = vpop.f32.mrb[22].mxu1 }
 0x637   : > { %1967 = vst [vmem:[%s4893_s22 + $0x70] sm:$0xff] %v1940_v8  ;;  %v1942_v4 = vpop.f32.mrb[23].mxu1 }
 0x638   : > { %1968 = vst [vmem:[%s4893_s22 + $0x78] sm:$0xff] %v1942_v4  ;;  %v1946_v49 = vpop.f32.mrb[24].mxu1 }
 0x639   : > { %2846 = vmatpush1.bf16.msra.mxu1 %v5052_v13  ;;  %1969 = vst [vmem:[%s4893_s22 + $0x80] sm:$0xff] %v1946_v49  ;;  %v1948_v34 = vpop.f32.mrb[25].mxu1 }
 0x63a   : > { %2847 = vmatprep.subr.bf16.mxu1 %v5053_v14  ;;  %1970 = vst [vmem:[%s4893_s22 + $0x88] sm:$0xff] %v1948_v34  ;;  %v1950_v39 = vpop.f32.mrb[26].mxu1 }
 0x63b   : > { %v1951_v48 = vpop.f32.mrb[27].mxu1 }
 0x63d   : > { %2848 = vmatpush1.bf16.msra.mxu1 %v5054_v15 }
 0x63e   : > { %2849 = vmatprep.subr.bf16.mxu1 %v5055_v16 }
 0x641   : > { %2850 = vmatpush1.bf16.msra.mxu1 %v5056_v17 }
 0x642   : > { %2851 = vmatprep.subr.bf16.mxu1 %v5057_v18 }
 0x645   : > { %2852 = vmatpush1.bf16.msra.mxu1 %v5058_v19 }
 0x648   : > { %2854 = vmatmul.mubr.bf16.vlgmr.msra.gmra.mrb[36].mxu1 %v2766_v23 }
 0x649   : > { %2863 = vmatprep.mubr.bf16.mxu1 %v2769_v30 }
 0x650   : > { %2864 = vmatmul.mubr.bf16.gmra.mrb[40].mxu1 %v2768_v35 }
 0x651   : > { %2974 = vmatprep.mubr.bf16.mxu1 %v5038_v0 }
 0x6db   : > { %v2804_v10 = vpop.f32.mrb[28].mxu1 }
 0x6dc   : > { %v2806_v25 = vpop.f32.mrb[29].mxu1  ;;  %v2872_v26 = vmul.f32 %v2804_v10, %v2804_v10 }
 0x6dd   : > { %v2808_v9 = vpop.f32.mrb[30].mxu1  ;;  %v2873_v7 = vmul.f32 %v2806_v25, %v2806_v25 }
 0x6de   : > { %v2810_v44 = vpop.f32.mrb[31].mxu1  ;;  %v2874_v38 = vmul.f32 %v2808_v9, %v2808_v9 }
 0x6df   : > { %v2875_v45 = vmul.f32 %v2810_v44, %v2810_v44 }
 0x6e3   : > { %v2814_v37 = vpop.f32.mrb[32].mxu1 }
 0x6e4   : > { %v2816_v58 = vpop.f32.mrb[33].mxu1  ;;  %v2876_v63 = vmul.f32 %v2814_v37, %v2814_v37 }
 0x6e5   : > { %v2818_v62 = vpop.f32.mrb[34].mxu1  ;;  %v2877_v52 = vmul.f32 %v2816_v58, %v2816_v58 }
 0x6e6   : > { %v2819_v11 = vpop.f32.mrb[35].mxu1 }
 0x71b   : > { %v2855_v59 = vpop.f32.mrb[36].mxu1 }
 0x71c   : > { %v2878_v55 = vmul.f32 %v2855_v59, %v2855_v59  ;;  %v2857_v2 = vpop.f32.mrb[37].mxu1 }
 0x71d   : > { %v2879_v6 = vmul.f32 %v2857_v2, %v2857_v2  ;;  %v2859_v1 = vpop.f32.mrb[38].mxu1 }
 0x71e   : > { %v2884_v3 = vadd.f32 %v2878_v55, %v2872_v26  ;;  %v2880_v23 = vmul.f32 %v2859_v1, %v2859_v1  ;;  %v2861_v22 = vpop.f32.mrb[39].mxu1 }
 0x71f   : > { %v2885_v60 = vadd.f32 %v2879_v6, %v2873_v7  ;;  %v2881_v24 = vmul.f32 %v2861_v22, %v2861_v22 }
 0x720   : > { %3810 = vrsqrt.f32 %v2884_v3  ;;  %v2886_v56 = vadd.f32 %v2880_v23, %v2874_v38  ;;  %vm2892_vm4 = vcmp.eq.f32.partialorder %v2884_v3, inf  ;;  %vm2894_vm3 = vcmp.eq.f32.partialorder %v2884_v3, 0.0 }
 0x721   : > { %3812 = vrsqrt.f32 %v2885_v60  ;;  %v2887_v28 = vadd.f32 %v2881_v24, %v2875_v45  ;;  %vm2899_vm6 = vcmp.eq.f32.partialorder %v2885_v60, inf  ;;  %vm2901_vm2 = vcmp.eq.f32.partialorder %v2885_v60, 0.0 }
 0x722   : > { %3814 = vrsqrt.f32 %v2886_v56  ;;  %v2902_v50 = vand.u32 2147483648, %v2885_v60  ;;  %v2895_v12 = vand.u32 2147483648, %v2884_v3  ;;  %vm2906_vm5 = vcmp.eq.f32.partialorder %v2886_v56, inf }
 0x723   : > { %3816 = vrsqrt.f32 %v2887_v28  ;;  %v2865_v53 = vpop.f32.mrb[40].mxu1  ;;  %v2909_v16 = vand.u32 2147483648, %v2886_v56  ;;  %vm2913_vm7 = vcmp.eq.f32.partialorder %v2887_v28, inf  ;;  %v2916_v17 = vand.u32 2147483648, %v2887_v28 }
 0x724   : > { %v2882_v29 = vmul.f32 %v2865_v53, %v2865_v53  ;;  %v2867_v54 = vpop.f32.mrb[41].mxu1  ;;  %vm2908_vm8 = vcmp.eq.f32.partialorder %v2886_v56, 0.0  ;;  %vm2915_vm9 = vcmp.eq.f32.partialorder %v2887_v28, 0.0 }
 0x725   : > { %v2883_v30 = vmul.f32 %v2867_v54, %v2867_v54  ;;  %v2869_v61 = vpop.f32.mrb[42].mxu1 }
 0x726   : > { %v2888_v33 = vadd.f32 %v2882_v29, %v2876_v63  ;;  %v2870_v35 = vpop.f32.mrb[43].mxu1 }
 0x727   : > { %v2889_v36 = vadd.f32 %v2883_v30, %v2877_v52 }
 0x728   : > { %3818 = vrsqrt.f32 %v2888_v33  ;;  %vm2920_vm11 = vcmp.eq.f32.partialorder %v2888_v33, inf  ;;  %v2923_v9 = vand.u32 2147483648, %v2888_v33  ;;  %vm2922_vm14 = vcmp.eq.f32.partialorder %v2888_v33, 0.0 }
 0x729   : > { %3820 = vrsqrt.f32 %v2889_v36  ;;  %vm2927_vm12 = vcmp.eq.f32.partialorder %v2889_v36, inf  ;;  %v2930_v44 = vand.u32 2147483648, %v2889_v36  ;;  %vm2929_vm15 = vcmp.eq.f32.partialorder %v2889_v36, 0.0 }
 0x72a   : > { %v3811_v31 = vpop.eup %3810 }
 0x72b   : > { %v3813_v27 = vpop.eup %3812  ;;  %v2891_v41 = vmul.f32 %v3811_v31, %v2884_v3 }
 0x72c   : > { %v3815_v43 = vpop.eup %3814  ;;  %v2898_v46 = vmul.f32 %v3813_v27, %v2885_v60 }
 0x72d   : > { %v3817_v5 = vpop.eup %3816  ;;  %v2893_v47 = vsel %vm2892_vm4, %v2884_v3, %v2891_v41  ;;  %v2905_v13 = vmul.f32 %v3815_v43, %v2886_v56 }
 0x72e   : > { %v2900_v14 = vsel %vm2899_vm6, %v2885_v60, %v2898_v46  ;;  %v2912_v15 = vmul.f32 %v3817_v5, %v2887_v28  ;;  %v2896_v20 = vsel %vm2894_vm3, %v2895_v12, %v2893_v47 }
 0x72f   : > { %v2907_v18 = vsel %vm2906_vm5, %v2886_v56, %v2905_v13  ;;  %v2903_v8 = vsel %vm2901_vm2, %v2902_v50, %v2900_v14 }
 0x730   : > { %v2914_v19 = vsel %vm2913_vm7, %v2887_v28, %v2912_v15  ;;  %v2910_v21 = vsel %vm2908_vm8, %v2909_v16, %v2907_v18 }
 0x731   : > { %v2917_v4 = vsel %vm2915_vm9, %v2916_v17, %v2914_v19  ;;  %v2932_v49 = vpack.c.bf16 %v2910_v21, %v2896_v20 }
 0x732   : > { %v3819_v34 = vpop.eup %3818  ;;  %v2933_v39 = vpack.c.bf16 %v2917_v4, %v2903_v8 }
 0x733   : > { %v3821_v48 = vpop.eup %3820  ;;  %v2919_v10 = vmul.f32 %v3819_v34, %v2888_v33 }
 0x734   : > { %2942 = vmatprep.subr.bf16.mxu1 %v2933_v39  ;;  %v2926_v25 = vmul.f32 %v3821_v48, %v2889_v36 }
 0x735   : > { %2943 = vmatpush1.bf16.msra.mxu1 %v2932_v49  ;;  %v2921_v37 = vsel %vm2920_vm11, %v2888_v33, %v2919_v10 }
 0x736   : > { %v2928_v58 = vsel %vm2927_vm12, %v2889_v36, %v2926_v25  ;;  %v2924_v62 = vsel %vm2922_vm14, %v2923_v9, %v2921_v37 }
 0x737   : > { %v2931_v11 = vsel %vm2929_vm15, %v2930_v44, %v2928_v58  ;;  %v2934_v59 = vpack.c.bf16 %v2924_v62, %v2924_v62 }
 0x738   : > { %v2935_v26 = vpack.c.bf16 %v2931_v11, %v2931_v11 }
 0x739   : > { %v2937_v55 = vsel %vm401_vm0, %v2934_v59, 0 }
 0x73a   : > { %3297 = vmatprep.subr.msk.bf16.mxu1 %vm401_vm0, %v2935_v26 }
 0x73b   : > { %2945 = vmatpush1.bf16.msra.mxu1 %v2937_v55 }
 0x73e   : > { %3298 = vmatmul.mubr.msk.bf16.vlgmr.msra.gmra.mrb[44].mxu1 %vm397_vm1, %v4650_v42 }
 0x73f   : > { %2984 = vmatprep.mubr.bf16.mxu1 %v5038_v0 }
 0x746   : > { %3299 = vmatmul.mubr.msk.bf16.gmra.mrb[48].mxu1 %vm397_vm1, %v4680_v51 }
 0x747   : > { %2994 = vmatprep.mubr.bf16.mxu1 %v5038_v0 }
 0x74e   : > { %3300 = vmatmul.mubr.msk.bf16.gmra.mrb[52].mxu1 %vm397_vm1, %v4706_v32 }
 0x74f   : > { %3004 = vmatprep.mubr.bf16.mxu1 %v5038_v0 }
 0x756   : > { %3301 = vmatmul.mubr.msk.bf16.gmra.mrb[56].mxu1 %vm397_vm1, %v4877_v40 }
 0x757   : > { %3014 = vmatprep.mubr.bf16.mxu1 %v5038_v0 }
 0x75e   : > { %3302 = vmatmul.mubr.msk.bf16.gmra.mrb[60].mxu1 %vm397_vm1, %v4885_v57 }
 0x811   : > { %v2976_v42 = vpop.f32.mrb[44].mxu1 }
 0x812   : > { %3303 = vst [vmem:[%s4893_s22 + $0x90] sm:$0xff] %v2976_v42  ;;  %v2978_v51 = vpop.f32.mrb[45].mxu1 }
 0x813   : > { %3304 = vst [vmem:[%s4893_s22 + $0x98] sm:$0xff] %v2978_v51  ;;  %v2980_v32 = vpop.f32.mrb[46].mxu1 }
 0x814   : > { %3305 = vst [vmem:[%s4893_s22 + $0xa0] sm:$0xff] %v2980_v32  ;;  %v2982_v2 = vpop.f32.mrb[47].mxu1 }
 0x815   : > { %3306 = vst [vmem:[%s4893_s22 + $0xa8] sm:$0xff] %v2982_v2 }
 0x819   : > { %v2986_v40 = vpop.f32.mrb[48].mxu1 }
 0x81a   : > { %3307 = vst [vmem:[%s4893_s22 + $0xb0] sm:$0xff] %v2986_v40  ;;  %v2988_v0 = vpop.f32.mrb[49].mxu1 }
 0x81b   : > { %3308 = vst [vmem:[%s4893_s22 + $0xb8] sm:$0xff] %v2988_v0  ;;  %v2990_v57 = vpop.f32.mrb[50].mxu1 }
 0x81c   : > { %3309 = vst [vmem:[%s4893_s22 + $0xc0] sm:$0xff] %v2990_v57  ;;  %v2992_v7 = vpop.f32.mrb[51].mxu1 }
 0x81d   : > { %3310 = vst [vmem:[%s4893_s22 + $0xc8] sm:$0xff] %v2992_v7 }
 0x821   : > { %v2996_v6 = vpop.f32.mrb[52].mxu1 }
 0x822   : > { %3311 = vst [vmem:[%s4893_s22 + $0xd0] sm:$0xff] %v2996_v6  ;;  %v2998_v1 = vpop.f32.mrb[53].mxu1 }
 0x823   : > { %3312 = vst [vmem:[%s4893_s22 + $0xd8] sm:$0xff] %v2998_v1  ;;  %v3000_v38 = vpop.f32.mrb[54].mxu1 }
 0x824   : > { %3313 = vst [vmem:[%s4893_s22 + $0xe0] sm:$0xff] %v3000_v38  ;;  %v3002_v3 = vpop.f32.mrb[55].mxu1 }
 0x825   : > { %3314 = vst [vmem:[%s4893_s22 + $0xe8] sm:$0xff] %v3002_v3 }
 0x829   : > { %v3006_v23 = vpop.f32.mrb[56].mxu1 }
 0x82a   : > { %3315 = vst [vmem:[%s4893_s22 + $0xf0] sm:$0xff] %v3006_v23  ;;  %v3008_v22 = vpop.f32.mrb[57].mxu1 }
 0x82b   : > { %3316 = vst [vmem:[%s4893_s22 + $0xf8] sm:$0xff] %v3008_v22  ;;  %v3010_v45 = vpop.f32.mrb[58].mxu1 }
 0x82c   : > { %3317 = vst [vmem:[%s4893_s22 + $0x100] sm:$0xff] %v3010_v45  ;;  %v3012_v60 = vpop.f32.mrb[59].mxu1 }
 0x82d   : > { %3318 = vst [vmem:[%s4893_s22 + $0x108] sm:$0xff] %v3012_v60 }
 0x831   : > { %v3016_v24 = vpop.f32.mrb[60].mxu1 }
 0x832   : > { %3319 = vst [vmem:[%s4893_s22 + $0x110] sm:$0xff] %v3016_v24  ;;  %v3018_v56 = vpop.f32.mrb[61].mxu1 }
 0x833   : > { %3320 = vst [vmem:[%s4893_s22 + $0x118] sm:$0xff] %v3018_v56  ;;  %v3020_v28 = vpop.f32.mrb[62].mxu1 }
 0x834   : > { %v3021_v53 = vpop.f32.mrb[63].mxu1 }
 0x835 PF: > { %s16_s21 = sadd.s32 1, %s3876_s21  }
 0x836   : > { %p13_p4 = scmp.ge.s32.totalorder %s16_s21, 4  }
 0x838   :  { %15 = sbr.rel (!%p13_p4) target bundleno = 1 (0x1), region = 85 }

</bundles_post_ra>
